<compile_context>
chip_gen: v6e
topology: v6e:2x2x1
jax: 0.10.0
libtpu: 0.0.40
codegen_flags: <defaults>
</compile_context>

<pallas_src>
import functools

import jax
import jax.numpy as jnp
from jax import lax
from jax.experimental import pallas as pl
from jax.experimental.pallas import tpu as pltpu


def _round_up(x, m):
    return -(-x // m) * m


def _resblock_kernel(x_ref, w1_ref, b1_ref, w2_ref, b2_ref, o_ref, *, H, W):
    """Fused conv3x3 -> ReLU -> conv3x3 -> (+x) on one (C, L) activation slab.

    x_ref : (1, Cin_p, H*W) or (Cin_p, L)  f32   (L = images_per_step * H*W)
    w1_ref: (9, Cmid_p, Cin_p)             bf16  per-tap conv1 weights
    b1_ref: (Cmid_p, 1)                    f32
    w2_ref: (9, Cout_p, Cmid_p)            bf16  per-tap conv2 weights
    b2_ref: (Cout_p, 1)                    f32
    o_ref : same layout as x_ref (Cout_p channels)
    """
    HW = H * W
    L = x_ref.shape[-1]

    # x is DMA'd once per step and reused as the identity-skip operand.
    x = x_ref[0] if len(x_ref.shape) == 3 else x_ref[...]          # (Cin_p, L) f32

    # Hoisted boundary masks: one (1, L) iota + a few (1, L) compares, shared
    # by both convs; jnp.where broadcasts them over the channel (sublane) axis.
    pos = lax.broadcasted_iota(jnp.int32, (1, L), 1)
    if L != HW:
        pos = pos % HW            # per-image flat index (batch stacked on lanes)
    col = pos % W
    row_ok = {-1: pos >= W, 0: None, 1: pos < (H - 1) * W}
    col_ok = {-1: col >= 1, 0: None, 1: col <= W - 2}
    masks = {}
    for dy in (-1, 0, 1):
        for dx in (-1, 0, 1):
            r, c = row_ok[dy], col_ok[dx]
            masks[(dy, dx)] = r if c is None else (c if r is None else jnp.logical_and(r, c))

    def conv3x3(a, w_ref):
        # 3x3 SAME conv as 9 accumulated MXU matmuls (one K=C contraction per
        # tap) -- no materialized (9*C, L) im2col patch, no concat stores.
        # Tap (dy, dx): value at output position p comes from a[p + dy*W + dx];
        # out-of-image (and cross-image) positions are masked to zero.
        acc = None
        k = 0
        for dy in (-1, 0, 1):
            for dx in (-1, 0, 1):
                off = dy * W + dx
                t = a if off == 0 else pltpu.roll(a, shift=(-off) % L, axis=1)
                m = masks[(dy, dx)]
                if m is not None:
                    t = jnp.where(m, t, 0.0)          # mask in f32 (v5e-native VPU)
                t = t.astype(jnp.bfloat16)            # narrow right before the MXU
                p = jnp.dot(w_ref[k], t, preferred_element_type=jnp.float32)
                acc = p if acc is None else acc + p
                k += 1
        return acc                                    # (C_out, L) f32

    h = jnp.maximum(conv3x3(x, w1_ref) + b1_ref[...], 0.0)         # conv1 + ReLU
    y = conv3x3(h, w2_ref) + b2_ref[...]                           # conv2
    res = (y + x).astype(o_ref.dtype)                              # identity skip (f32)
    o_ref[...] = res[None] if len(o_ref.shape) == 3 else res


@functools.partial(jax.jit, static_argnames=("images_per_step",))
def residual_block(x_nchw, w1, b1, w2, b2, *, images_per_step=None):
    """x_nchw: (N, C, H, W) f32; w1/w2 in HWIO layout.  Returns (N, C, H, W)."""
    N, C, H, W = x_nchw.shape
    Cmid = w1.shape[-1]
    Cout = w2.shape[-1]
    assert Cout == C, "identity skip requires Cout == Cin"
    HW = H * W

    Cin_p, Cmid_p, Cout_p = (_round_up(c, 8) for c in (C, Cmid, Cout))

    def pad_axis(a, axis, target):
        if a.shape[axis] == target:
            return a
        cfg = [(0, 0)] * a.ndim
        cfg[axis] = (0, target - a.shape[axis])
        return jnp.pad(a, cfg)

    # Per-tap weight matrices (k, O, I), k = (dy+1)*3 + (dx+1) matches the
    # kernel's tap loop and HWIO's (ky, kx) ordering.  Cast to bf16 for the
    # MXU; accumulation stays f32 inside the kernel.
    w1m = pad_axis(pad_axis(w1, 2, Cin_p), 3, Cmid_p)      # (3,3,Cin_p,Cmid_p)
    w2m = pad_axis(pad_axis(w2, 2, Cmid_p), 3, Cout_p)     # (3,3,Cmid_p,Cout_p)
    w1m = jnp.transpose(w1m, (0, 1, 3, 2)).reshape(9, Cmid_p, Cin_p).astype(jnp.bfloat16)
    w2m = jnp.transpose(w2m, (0, 1, 3, 2)).reshape(9, Cout_p, Cmid_p).astype(jnp.bfloat16)
    b1c = pad_axis(b1, 0, Cmid_p).reshape(Cmid_p, 1).astype(jnp.float32)
    b2c = pad_axis(b2, 0, Cout_p).reshape(Cout_p, 1).astype(jnp.float32)

    # Channel-major, lane-dense activations; channels padded ONCE here so the
    # kernel needs no per-step scratch copy / zero-fill.
    x3 = pad_axis(x_nchw.astype(jnp.float32).reshape(N, C, HW), 1, Cin_p)  # (N,Cin_p,HW)

    # VMEM budget: v7x has 64 MiB/core vs 128 MiB on v5e/v6e.  Raise the
    # scoped limit toward physical capacity and size the per-step block off it.
    try:
        vmem_cap = int(pltpu.get_tpu_info().vmem_capacity_bytes)
    except Exception:
        vmem_cap = 64 * 1024 * 1024            # conservative (v7x per-core)
    vmem_limit = min(int(vmem_cap * 0.85), 100 * 1024 * 1024)
    vmem_limit = max(vmem_limit, 32 * 1024 * 1024)

    w_bytes = (w1m.size + w2m.size) * 2

    def step_bytes(L):
        io = 2 * 4 * (Cin_p + Cout_p) * L                     # dbl-buffered x/out blocks
        acts = L * (4 * Cmid_p + 4 * Cout_p                   # h, conv2 accumulator (f32)
                    + 6 * max(Cin_p, Cmid_p))                 # live f32 tap + its bf16 copy
        return io + acts + 2 * w_bytes + (2 << 20)            # + weights + slack

    if images_per_step is None:
        # Fold as many batch images per grid step as the VMEM budget allows
        # (raises MXU utilization / amortizes per-step overhead at small C).
        nb = 1
        for d in range(1, N + 1):
            if N % d:
                continue
            if d != N and (d * HW) % 128 != 0:
                continue                                      # keep lane width 128-aligned
            if step_bytes(d * HW) <= int(0.75 * vmem_limit):
                nb = d
    else:
        nb = int(images_per_step)
    assert N % nb == 0

    kernel = functools.partial(_resblock_kernel, H=H, W=W)
    wspecs = [
        pl.BlockSpec(w1m.shape, lambda n: (0, 0, 0)),   # weights/biases: constant
        pl.BlockSpec(b1c.shape, lambda n: (0, 0)),      # index maps -> resident,
        pl.BlockSpec(w2m.shape, lambda n: (0, 0, 0)),   # fetched once.
        pl.BlockSpec(b2c.shape, lambda n: (0, 0)),
    ]
    cparams = pltpu.CompilerParams(
        dimension_semantics=("parallel",), vmem_limit_bytes=vmem_limit)

    if nb > 1:
        # Batch-stacked path: lanes carry nb*H*W so the per-tap matmuls see a
        # wide N dimension; cross-image roll bleed is killed by the row masks.
        x_cm = jnp.transpose(x3, (1, 0, 2)).reshape(Cin_p, N * HW)
        out = pl.pallas_call(
            kernel,
            out_shape=jax.ShapeDtypeStruct((Cout_p, N * HW), jnp.float32),
            grid=(N // nb,),
            in_specs=[pl.BlockSpec((Cin_p, nb * HW), lambda n: (0, n))] + wspecs,
            out_specs=pl.BlockSpec((Cout_p, nb * HW), lambda n: (0, n)),
            compiler_params=cparams,
        )(x_cm, w1m, b1c, w2m, b2c)
        out = jnp.transpose(out.reshape(Cout_p, N, HW), (1, 0, 2))     # (N,Cout_p,HW)
    else:
        # One image per step: NCHW -> (N, C, HW) is a free reshape (no extra
        # HBM copy / transpose of x); x is DMA'd once and reused for the skip.
        out = pl.pallas_call(
            kernel,
            out_shape=jax.ShapeDtypeStruct((N, Cout_p, HW), jnp.float32),
            grid=(N,),
            in_specs=[pl.BlockSpec((1, Cin_p, HW), lambda n: (n, 0, 0))] + wspecs,
            out_specs=pl.BlockSpec((1, Cout_p, HW), lambda n: (n, 0, 0)),
            compiler_params=cparams,
        )(x3, w1m, b1c, w2m, b2c)

    return out[:, :Cout, :].reshape(N, Cout, H, W)


def _reference(x_nchw, w1, b1, w2, b2):
    """Plain-JAX reference (PyTorch Conv2d/ReLU semantics).  Conv inputs are
    rounded to bf16 to mirror the kernel's MXU inputs; run eagerly so the
    round-trip is not folded away."""
    rb = lambda a: a.astype(jnp.bfloat16).astype(jnp.float32)
    x = jnp.transpose(x_nchw, (0, 2, 3, 1))
    dn = ("NHWC", "HWIO", "NHWC")
    h = lax.conv_general_dilated(rb(x), rb(w1), (1, 1), "SAME",
                                 dimension_numbers=dn) + b1
    h = jnp.maximum(h, 0.0)
    y = lax.conv_general_dilated(rb(h), rb(w2), (1, 1), "SAME",
                                 dimension_numbers=dn) + b2
    y = y + x  # skip = Identity (full precision)
    return jnp.transpose(y, (0, 3, 1, 2))


if __name__ == "__main__":
    def make_case(key, N, C, H, W, Cmid):
        kx, k1, kb1, k2, kb2 = jax.random.split(key, 5)
        x = jax.random.normal(kx, (N, C, H, W), dtype=jnp.float32)
        f1 = (C * 9) ** -0.5
        w1 = jax.random.uniform(k1, (3, 3, C, Cmid), jnp.float32, -f1, f1)
        b1 = jax.random.uniform(kb1, (Cmid,), jnp.float32, -f1, f1)
        f2 = (Cmid * 9) ** -0.5
        w2 = jax.random.uniform(k2, (3, 3, Cmid, C), jnp.float32, -f2, f2)
        b2 = jax.random.uniform(kb2, (C,), jnp.float32, -f2, f2)
        return x, w1, b1, w2, b2

    key = jax.random.PRNGKey(0)
    k_small, k_big = jax.random.split(key)

    # Small case (C=4 -> exercises channel padding); check both the
    # batch-stacked path (auto) and the one-image-per-step path.
    args = make_case(k_small, 2, 4, 16, 16, 8)
    ref = _reference(*args)
    out = jax.block_until_ready(residual_block(*args))
    assert out.shape == (2, 4, 16, 16)
    assert jnp.allclose(out, ref, atol=1e-3, rtol=1e-3), "stacked-path mismatch"
    out1 = jax.block_until_ready(residual_block(*args, images_per_step=1))
    assert jnp.allclose(out1, ref, atol=1e-3, rtol=1e-3), "per-image-path mismatch"

    # Moderate case (aligned channels, VMEM-sized batch-stacked blocks).
    args = make_case(k_big, 4, 64, 32, 32, 64)
    ref = _reference(*args)
    out = jax.block_until_ready(residual_block(*args))
    assert out.shape == (4, 64, 32, 32)
    assert jnp.allclose(out, ref, atol=2e-3, rtol=2e-3), "moderate-case mismatch"

    print("KERNEL_OK")
</pallas_src>

<mosaic_0001>
module attributes {stable_mosaic.version = 11 : i64} {
  func.func @_resblock_kernel(%arg0: i32, %arg1: memref<8x512xf32, #tpu.memory_space<vmem>>, %arg2: memref<9x8x8xbf16, #tpu.memory_space<vmem>>, %arg3: memref<8x1xf32, #tpu.memory_space<vmem>>, %arg4: memref<9x8x8xbf16, #tpu.memory_space<vmem>>, %arg5: memref<8x1xf32, #tpu.memory_space<vmem>>, %arg6: memref<8x512xf32, #tpu.memory_space<vmem>>) attributes {dimension_semantics = [#tpu.dimension_semantics<parallel>], iteration_bounds = array<i64: 1>, scalar_prefetch = 0 : i64, scratch_operands = 0 : i64, tpu.core_type = #tpu.core_type<tc>, window_params = [{transform_indices = @transform_0, window_bounds = array<i64: 8, 512>}, {pipeline_mode = #tpu.pipeline_mode<synchronous>, transform_indices = @transform_1, window_bounds = array<i64: 9, 8, 8>}, {pipeline_mode = #tpu.pipeline_mode<synchronous>, transform_indices = @transform_2, window_bounds = array<i64: 8, 1>}, {pipeline_mode = #tpu.pipeline_mode<synchronous>, transform_indices = @transform_3, window_bounds = array<i64: 9, 8, 8>}, {pipeline_mode = #tpu.pipeline_mode<synchronous>, transform_indices = @transform_4, window_bounds = array<i64: 8, 1>}, {transform_indices = @transform_5, window_bounds = array<i64: 8, 512>}]} {
    %c0 = arith.constant 0 : index
    %c0_0 = arith.constant 0 : index
    %0 = vector.load %arg1[%c0, %c0_0] : memref<8x512xf32, #tpu.memory_space<vmem>>, vector<8x512xf32>
    %1 = tpu.iota {dimensions = array<i32: 1>} : vector<1x512xi32>
    %c256_i32 = arith.constant 256 : i32
    %c0_i32 = arith.constant 0 : i32
    %2 = arith.cmpi eq, %c256_i32, %c0_i32 : i32
    %c1_i32 = arith.constant 1 : i32
    %3 = arith.select %2, %c1_i32, %c256_i32 : i32
    %4 = vector.broadcast %3 : i32 to vector<1x512xi32>
    %5 = arith.remsi %1, %4 : vector<1x512xi32>
    %c0_i32_1 = arith.constant 0 : i32
    %6 = vector.broadcast %c0_i32_1 : i32 to vector<1x512xi32>
    %7 = arith.cmpi ne, %5, %6 : vector<1x512xi32>
    %c0_i32_2 = arith.constant 0 : i32
    %8 = vector.broadcast %c0_i32_2 : i32 to vector<1x512xi32>
    %9 = arith.cmpi slt, %5, %8 : vector<1x512xi32>
    %c0_i32_3 = arith.constant 0 : i32
    %10 = arith.cmpi slt, %3, %c0_i32_3 : i32
    %11 = vector.broadcast %10 : i1 to vector<1x512xi1>
    %12 = vector.broadcast %11 : vector<1x512xi1> to vector<1x512xi1>
    %13 = arith.xori %9, %12 : vector<1x512xi1>
    %14 = arith.andi %13, %7 : vector<1x512xi1>
    %15 = vector.broadcast %3 : i32 to vector<1x512xi32>
    %16 = arith.addi %5, %15 : vector<1x512xi32>
    %17 = arith.select %14, %16, %5 : vector<1x512xi1>, vector<1x512xi32>
    %c16_i32 = arith.constant 16 : i32
    %c0_i32_4 = arith.constant 0 : i32
    %18 = arith.cmpi eq, %c16_i32, %c0_i32_4 : i32
    %c1_i32_5 = arith.constant 1 : i32
    %19 = arith.select %18, %c1_i32_5, %c16_i32 : i32
    %20 = vector.broadcast %19 : i32 to vector<1x512xi32>
    %21 = arith.remsi %17, %20 : vector<1x512xi32>
    %c0_i32_6 = arith.constant 0 : i32
    %22 = vector.broadcast %c0_i32_6 : i32 to vector<1x512xi32>
    %23 = arith.cmpi ne, %21, %22 : vector<1x512xi32>
    %c0_i32_7 = arith.constant 0 : i32
    %24 = vector.broadcast %c0_i32_7 : i32 to vector<1x512xi32>
    %25 = arith.cmpi slt, %21, %24 : vector<1x512xi32>
    %c0_i32_8 = arith.constant 0 : i32
    %26 = arith.cmpi slt, %19, %c0_i32_8 : i32
    %27 = vector.broadcast %26 : i1 to vector<1x512xi1>
    %28 = vector.broadcast %27 : vector<1x512xi1> to vector<1x512xi1>
    %29 = arith.xori %25, %28 : vector<1x512xi1>
    %30 = arith.andi %29, %23 : vector<1x512xi1>
    %31 = vector.broadcast %19 : i32 to vector<1x512xi32>
    %32 = arith.addi %21, %31 : vector<1x512xi32>
    %33 = arith.select %30, %32, %21 : vector<1x512xi1>, vector<1x512xi32>
    %c16_i32_9 = arith.constant 16 : i32
    %34 = vector.broadcast %c16_i32_9 : i32 to vector<1x512xi32>
    %35 = arith.cmpi sge, %17, %34 : vector<1x512xi32>
    %c240_i32 = arith.constant 240 : i32
    %36 = vector.broadcast %c240_i32 : i32 to vector<1x512xi32>
    %37 = arith.cmpi slt, %17, %36 : vector<1x512xi32>
    %c1_i32_10 = arith.constant 1 : i32
    %38 = vector.broadcast %c1_i32_10 : i32 to vector<1x512xi32>
    %39 = arith.cmpi sge, %33, %38 : vector<1x512xi32>
    %c14_i32 = arith.constant 14 : i32
    %40 = vector.broadcast %c14_i32 : i32 to vector<1x512xi32>
    %41 = arith.cmpi sle, %33, %40 : vector<1x512xi32>
    %42 = arith.andi %35, %39 : vector<1x512xi1>
    %43 = arith.andi %35, %41 : vector<1x512xi1>
    %44 = arith.andi %37, %39 : vector<1x512xi1>
    %45 = arith.andi %37, %41 : vector<1x512xi1>
    %c17_i32 = arith.constant 17 : i32
    %46 = tpu.dynamic_rotate %0 by %c17_i32 dim 1 : vector<8x512xf32>, i32 -> vector<8x512xf32>
    %cst = arith.constant 0.000000e+00 : f32
    %47 = vector.shape_cast %42 : vector<1x512xi1> to vector<1x512xi1>
    %48 = vector.broadcast %47 : vector<1x512xi1> to vector<8x512xi1>
    %49 = vector.broadcast %cst : f32 to vector<8x512xf32>
    %50 = arith.select %48, %46, %49 : vector<8x512xi1>, vector<8x512xf32>
    %51 = arith.truncf %50 : vector<8x512xf32> to vector<8x512xbf16>
    %c0_11 = arith.constant 0 : index
    %c0_12 = arith.constant 0 : index
    %c0_13 = arith.constant 0 : index
    %52 = vector.load %arg2[%c0_11, %c0_12, %c0_13] : memref<9x8x8xbf16, #tpu.memory_space<vmem>>, vector<1x8x8xbf16>
    %53 = vector.shape_cast %52 : vector<1x8x8xbf16> to vector<8x8xbf16>
    %cst_14 = arith.constant dense<0.000000e+00> : vector<8x512xf32>
    %54 = tpu.matmul %53, %51, %cst_14 {dimension_numbers = #tpu.dot_dimension_numbers<[1], [0], [0], [1], [0, 0, 1, 1], [], []>} : vector<8x8xbf16>, vector<8x512xbf16>, vector<8x512xf32> -> vector<8x512xf32>
    %c16_i32_15 = arith.constant 16 : i32
    %55 = tpu.dynamic_rotate %0 by %c16_i32_15 dim 1 : vector<8x512xf32>, i32 -> vector<8x512xf32>
    %cst_16 = arith.constant 0.000000e+00 : f32
    %56 = vector.shape_cast %35 : vector<1x512xi1> to vector<1x512xi1>
    %57 = vector.broadcast %56 : vector<1x512xi1> to vector<8x512xi1>
    %58 = vector.broadcast %cst_16 : f32 to vector<8x512xf32>
    %59 = arith.select %57, %55, %58 : vector<8x512xi1>, vector<8x512xf32>
    %60 = arith.truncf %59 : vector<8x512xf32> to vector<8x512xbf16>
    %c1 = arith.constant 1 : index
    %c0_17 = arith.constant 0 : index
    %c0_18 = arith.constant 0 : index
    %61 = vector.load %arg2[%c1, %c0_17, %c0_18] : memref<9x8x8xbf16, #tpu.memory_space<vmem>>, vector<1x8x8xbf16>
    %62 = vector.shape_cast %61 : vector<1x8x8xbf16> to vector<8x8xbf16>
    %cst_19 = arith.constant dense<0.000000e+00> : vector<8x512xf32>
    %63 = tpu.matmul %62, %60, %cst_19 {dimension_numbers = #tpu.dot_dimension_numbers<[1], [0], [0], [1], [0, 0, 1, 1], [], []>} : vector<8x8xbf16>, vector<8x512xbf16>, vector<8x512xf32> -> vector<8x512xf32>
    %64 = arith.addf %54, %63 : vector<8x512xf32>
    %c15_i32 = arith.constant 15 : i32
    %65 = tpu.dynamic_rotate %0 by %c15_i32 dim 1 : vector<8x512xf32>, i32 -> vector<8x512xf32>
    %cst_20 = arith.constant 0.000000e+00 : f32
    %66 = vector.shape_cast %43 : vector<1x512xi1> to vector<1x512xi1>
    %67 = vector.broadcast %66 : vector<1x512xi1> to vector<8x512xi1>
    %68 = vector.broadcast %cst_20 : f32 to vector<8x512xf32>
    %69 = arith.select %67, %65, %68 : vector<8x512xi1>, vector<8x512xf32>
    %70 = arith.truncf %69 : vector<8x512xf32> to vector<8x512xbf16>
    %c2 = arith.constant 2 : index
    %c0_21 = arith.constant 0 : index
    %c0_22 = arith.constant 0 : index
    %71 = vector.load %arg2[%c2, %c0_21, %c0_22] : memref<9x8x8xbf16, #tpu.memory_space<vmem>>, vector<1x8x8xbf16>
    %72 = vector.shape_cast %71 : vector<1x8x8xbf16> to vector<8x8xbf16>
    %cst_23 = arith.constant dense<0.000000e+00> : vector<8x512xf32>
    %73 = tpu.matmul %72, %70, %cst_23 {dimension_numbers = #tpu.dot_dimension_numbers<[1], [0], [0], [1], [0, 0, 1, 1], [], []>} : vector<8x8xbf16>, vector<8x512xbf16>, vector<8x512xf32> -> vector<8x512xf32>
    %74 = arith.addf %64, %73 : vector<8x512xf32>
    %c1_i32_24 = arith.constant 1 : i32
    %75 = tpu.dynamic_rotate %0 by %c1_i32_24 dim 1 : vector<8x512xf32>, i32 -> vector<8x512xf32>
    %cst_25 = arith.constant 0.000000e+00 : f32
    %76 = vector.shape_cast %39 : vector<1x512xi1> to vector<1x512xi1>
    %77 = vector.broadcast %76 : vector<1x512xi1> to vector<8x512xi1>
    %78 = vector.broadcast %cst_25 : f32 to vector<8x512xf32>
    %79 = arith.select %77, %75, %78 : vector<8x512xi1>, vector<8x512xf32>
    %80 = arith.truncf %79 : vector<8x512xf32> to vector<8x512xbf16>
    %c3 = arith.constant 3 : index
    %c0_26 = arith.constant 0 : index
    %c0_27 = arith.constant 0 : index
    %81 = vector.load %arg2[%c3, %c0_26, %c0_27] : memref<9x8x8xbf16, #tpu.memory_space<vmem>>, vector<1x8x8xbf16>
    %82 = vector.shape_cast %81 : vector<1x8x8xbf16> to vector<8x8xbf16>
    %cst_28 = arith.constant dense<0.000000e+00> : vector<8x512xf32>
    %83 = tpu.matmul %82, %80, %cst_28 {dimension_numbers = #tpu.dot_dimension_numbers<[1], [0], [0], [1], [0, 0, 1, 1], [], []>} : vector<8x8xbf16>, vector<8x512xbf16>, vector<8x512xf32> -> vector<8x512xf32>
    %84 = arith.addf %74, %83 : vector<8x512xf32>
    %85 = arith.truncf %0 : vector<8x512xf32> to vector<8x512xbf16>
    %c4 = arith.constant 4 : index
    %c0_29 = arith.constant 0 : index
    %c0_30 = arith.constant 0 : index
    %86 = vector.load %arg2[%c4, %c0_29, %c0_30] : memref<9x8x8xbf16, #tpu.memory_space<vmem>>, vector<1x8x8xbf16>
    %87 = vector.shape_cast %86 : vector<1x8x8xbf16> to vector<8x8xbf16>
    %cst_31 = arith.constant dense<0.000000e+00> : vector<8x512xf32>
    %88 = tpu.matmul %87, %85, %cst_31 {dimension_numbers = #tpu.dot_dimension_numbers<[1], [0], [0], [1], [0, 0, 1, 1], [], []>} : vector<8x8xbf16>, vector<8x512xbf16>, vector<8x512xf32> -> vector<8x512xf32>
    %89 = arith.addf %84, %88 : vector<8x512xf32>
    %c511_i32 = arith.constant 511 : i32
    %90 = tpu.dynamic_rotate %0 by %c511_i32 dim 1 : vector<8x512xf32>, i32 -> vector<8x512xf32>
    %cst_32 = arith.constant 0.000000e+00 : f32
    %91 = vector.shape_cast %41 : vector<1x512xi1> to vector<1x512xi1>
    %92 = vector.broadcast %91 : vector<1x512xi1> to vector<8x512xi1>
    %93 = vector.broadcast %cst_32 : f32 to vector<8x512xf32>
    %94 = arith.select %92, %90, %93 : vector<8x512xi1>, vector<8x512xf32>
    %95 = arith.truncf %94 : vector<8x512xf32> to vector<8x512xbf16>
    %c5 = arith.constant 5 : index
    %c0_33 = arith.constant 0 : index
    %c0_34 = arith.constant 0 : index
    %96 = vector.load %arg2[%c5, %c0_33, %c0_34] : memref<9x8x8xbf16, #tpu.memory_space<vmem>>, vector<1x8x8xbf16>
    %97 = vector.shape_cast %96 : vector<1x8x8xbf16> to vector<8x8xbf16>
    %cst_35 = arith.constant dense<0.000000e+00> : vector<8x512xf32>
    %98 = tpu.matmul %97, %95, %cst_35 {dimension_numbers = #tpu.dot_dimension_numbers<[1], [0], [0], [1], [0, 0, 1, 1], [], []>} : vector<8x8xbf16>, vector<8x512xbf16>, vector<8x512xf32> -> vector<8x512xf32>
    %99 = arith.addf %89, %98 : vector<8x512xf32>
    %c497_i32 = arith.constant 497 : i32
    %100 = tpu.dynamic_rotate %0 by %c497_i32 dim 1 : vector<8x512xf32>, i32 -> vector<8x512xf32>
    %cst_36 = arith.constant 0.000000e+00 : f32
    %101 = vector.shape_cast %44 : vector<1x512xi1> to vector<1x512xi1>
    %102 = vector.broadcast %101 : vector<1x512xi1> to vector<8x512xi1>
    %103 = vector.broadcast %cst_36 : f32 to vector<8x512xf32>
    %104 = arith.select %102, %100, %103 : vector<8x512xi1>, vector<8x512xf32>
    %105 = arith.truncf %104 : vector<8x512xf32> to vector<8x512xbf16>
    %c6 = arith.constant 6 : index
    %c0_37 = arith.constant 0 : index
    %c0_38 = arith.constant 0 : index
    %106 = vector.load %arg2[%c6, %c0_37, %c0_38] : memref<9x8x8xbf16, #tpu.memory_space<vmem>>, vector<1x8x8xbf16>
    %107 = vector.shape_cast %106 : vector<1x8x8xbf16> to vector<8x8xbf16>
    %cst_39 = arith.constant dense<0.000000e+00> : vector<8x512xf32>
    %108 = tpu.matmul %107, %105, %cst_39 {dimension_numbers = #tpu.dot_dimension_numbers<[1], [0], [0], [1], [0, 0, 1, 1], [], []>} : vector<8x8xbf16>, vector<8x512xbf16>, vector<8x512xf32> -> vector<8x512xf32>
    %109 = arith.addf %99, %108 : vector<8x512xf32>
    %c496_i32 = arith.constant 496 : i32
    %110 = tpu.dynamic_rotate %0 by %c496_i32 dim 1 : vector<8x512xf32>, i32 -> vector<8x512xf32>
    %cst_40 = arith.constant 0.000000e+00 : f32
    %111 = vector.shape_cast %37 : vector<1x512xi1> to vector<1x512xi1>
    %112 = vector.broadcast %111 : vector<1x512xi1> to vector<8x512xi1>
    %113 = vector.broadcast %cst_40 : f32 to vector<8x512xf32>
    %114 = arith.select %112, %110, %113 : vector<8x512xi1>, vector<8x512xf32>
    %115 = arith.truncf %114 : vector<8x512xf32> to vector<8x512xbf16>
    %c7 = arith.constant 7 : index
    %c0_41 = arith.constant 0 : index
    %c0_42 = arith.constant 0 : index
    %116 = vector.load %arg2[%c7, %c0_41, %c0_42] : memref<9x8x8xbf16, #tpu.memory_space<vmem>>, vector<1x8x8xbf16>
    %117 = vector.shape_cast %116 : vector<1x8x8xbf16> to vector<8x8xbf16>
    %cst_43 = arith.constant dense<0.000000e+00> : vector<8x512xf32>
    %118 = tpu.matmul %117, %115, %cst_43 {dimension_numbers = #tpu.dot_dimension_numbers<[1], [0], [0], [1], [0, 0, 1, 1], [], []>} : vector<8x8xbf16>, vector<8x512xbf16>, vector<8x512xf32> -> vector<8x512xf32>
    %119 = arith.addf %109, %118 : vector<8x512xf32>
    %c495_i32 = arith.constant 495 : i32
    %120 = tpu.dynamic_rotate %0 by %c495_i32 dim 1 : vector<8x512xf32>, i32 -> vector<8x512xf32>
    %cst_44 = arith.constant 0.000000e+00 : f32
    %121 = vector.shape_cast %45 : vector<1x512xi1> to vector<1x512xi1>
    %122 = vector.broadcast %121 : vector<1x512xi1> to vector<8x512xi1>
    %123 = vector.broadcast %cst_44 : f32 to vector<8x512xf32>
    %124 = arith.select %122, %120, %123 : vector<8x512xi1>, vector<8x512xf32>
    %125 = arith.truncf %124 : vector<8x512xf32> to vector<8x512xbf16>
    %c8 = arith.constant 8 : index
    %c0_45 = arith.constant 0 : index
    %c0_46 = arith.constant 0 : index
    %126 = vector.load %arg2[%c8, %c0_45, %c0_46] : memref<9x8x8xbf16, #tpu.memory_space<vmem>>, vector<1x8x8xbf16>
    %127 = vector.shape_cast %126 : vector<1x8x8xbf16> to vector<8x8xbf16>
    %cst_47 = arith.constant dense<0.000000e+00> : vector<8x512xf32>
    %128 = tpu.matmul %127, %125, %cst_47 {dimension_numbers = #tpu.dot_dimension_numbers<[1], [0], [0], [1], [0, 0, 1, 1], [], []>} : vector<8x8xbf16>, vector<8x512xbf16>, vector<8x512xf32> -> vector<8x512xf32>
    %129 = arith.addf %119, %128 : vector<8x512xf32>
    %c0_48 = arith.constant 0 : index
    %c0_49 = arith.constant 0 : index
    %130 = vector.load %arg3[%c0_48, %c0_49] : memref<8x1xf32, #tpu.memory_space<vmem>>, vector<8x1xf32>
    %131 = vector.broadcast %130 : vector<8x1xf32> to vector<8x512xf32>
    %132 = arith.addf %129, %131 : vector<8x512xf32>
    %cst_50 = arith.constant 0.000000e+00 : f32
    %133 = vector.broadcast %cst_50 : f32 to vector<8x512xf32>
    %134 = arith.maximumf %132, %133 : vector<8x512xf32>
    %c17_i32_51 = arith.constant 17 : i32
    %135 = tpu.dynamic_rotate %134 by %c17_i32_51 dim 1 : vector<8x512xf32>, i32 -> vector<8x512xf32>
    %cst_52 = arith.constant 0.000000e+00 : f32
    %136 = vector.shape_cast %42 : vector<1x512xi1> to vector<1x512xi1>
    %137 = vector.broadcast %136 : vector<1x512xi1> to vector<8x512xi1>
    %138 = vector.broadcast %cst_52 : f32 to vector<8x512xf32>
    %139 = arith.select %137, %135, %138 : vector<8x512xi1>, vector<8x512xf32>
    %140 = arith.truncf %139 : vector<8x512xf32> to vector<8x512xbf16>
    %c0_53 = arith.constant 0 : index
    %c0_54 = arith.constant 0 : index
    %c0_55 = arith.constant 0 : index
    %141 = vector.load %arg4[%c0_53, %c0_54, %c0_55] : memref<9x8x8xbf16, #tpu.memory_space<vmem>>, vector<1x8x8xbf16>
    %142 = vector.shape_cast %141 : vector<1x8x8xbf16> to vector<8x8xbf16>
    %cst_56 = arith.constant dense<0.000000e+00> : vector<8x512xf32>
    %143 = tpu.matmul %142, %140, %cst_56 {dimension_numbers = #tpu.dot_dimension_numbers<[1], [0], [0], [1], [0, 0, 1, 1], [], []>} : vector<8x8xbf16>, vector<8x512xbf16>, vector<8x512xf32> -> vector<8x512xf32>
    %c16_i32_57 = arith.constant 16 : i32
    %144 = tpu.dynamic_rotate %134 by %c16_i32_57 dim 1 : vector<8x512xf32>, i32 -> vector<8x512xf32>
    %cst_58 = arith.constant 0.000000e+00 : f32
    %145 = vector.shape_cast %35 : vector<1x512xi1> to vector<1x512xi1>
    %146 = vector.broadcast %145 : vector<1x512xi1> to vector<8x512xi1>
    %147 = vector.broadcast %cst_58 : f32 to vector<8x512xf32>
    %148 = arith.select %146, %144, %147 : vector<8x512xi1>, vector<8x512xf32>
    %149 = arith.truncf %148 : vector<8x512xf32> to vector<8x512xbf16>
    %c1_59 = arith.constant 1 : index
    %c0_60 = arith.constant 0 : index
    %c0_61 = arith.constant 0 : index
    %150 = vector.load %arg4[%c1_59, %c0_60, %c0_61] : memref<9x8x8xbf16, #tpu.memory_space<vmem>>, vector<1x8x8xbf16>
    %151 = vector.shape_cast %150 : vector<1x8x8xbf16> to vector<8x8xbf16>
    %cst_62 = arith.constant dense<0.000000e+00> : vector<8x512xf32>
    %152 = tpu.matmul %151, %149, %cst_62 {dimension_numbers = #tpu.dot_dimension_numbers<[1], [0], [0], [1], [0, 0, 1, 1], [], []>} : vector<8x8xbf16>, vector<8x512xbf16>, vector<8x512xf32> -> vector<8x512xf32>
    %153 = arith.addf %143, %152 : vector<8x512xf32>
    %c15_i32_63 = arith.constant 15 : i32
    %154 = tpu.dynamic_rotate %134 by %c15_i32_63 dim 1 : vector<8x512xf32>, i32 -> vector<8x512xf32>
    %cst_64 = arith.constant 0.000000e+00 : f32
    %155 = vector.shape_cast %43 : vector<1x512xi1> to vector<1x512xi1>
    %156 = vector.broadcast %155 : vector<1x512xi1> to vector<8x512xi1>
    %157 = vector.broadcast %cst_64 : f32 to vector<8x512xf32>
    %158 = arith.select %156, %154, %157 : vector<8x512xi1>, vector<8x512xf32>
    %159 = arith.truncf %158 : vector<8x512xf32> to vector<8x512xbf16>
    %c2_65 = arith.constant 2 : index
    %c0_66 = arith.constant 0 : index
    %c0_67 = arith.constant 0 : index
    %160 = vector.load %arg4[%c2_65, %c0_66, %c0_67] : memref<9x8x8xbf16, #tpu.memory_space<vmem>>, vector<1x8x8xbf16>
    %161 = vector.shape_cast %160 : vector<1x8x8xbf16> to vector<8x8xbf16>
    %cst_68 = arith.constant dense<0.000000e+00> : vector<8x512xf32>
    %162 = tpu.matmul %161, %159, %cst_68 {dimension_numbers = #tpu.dot_dimension_numbers<[1], [0], [0], [1], [0, 0, 1, 1], [], []>} : vector<8x8xbf16>, vector<8x512xbf16>, vector<8x512xf32> -> vector<8x512xf32>
    %163 = arith.addf %153, %162 : vector<8x512xf32>
    %c1_i32_69 = arith.constant 1 : i32
    %164 = tpu.dynamic_rotate %134 by %c1_i32_69 dim 1 : vector<8x512xf32>, i32 -> vector<8x512xf32>
    %cst_70 = arith.constant 0.000000e+00 : f32
    %165 = vector.shape_cast %39 : vector<1x512xi1> to vector<1x512xi1>
    %166 = vector.broadcast %165 : vector<1x512xi1> to vector<8x512xi1>
    %167 = vector.broadcast %cst_70 : f32 to vector<8x512xf32>
    %168 = arith.select %166, %164, %167 : vector<8x512xi1>, vector<8x512xf32>
    %169 = arith.truncf %168 : vector<8x512xf32> to vector<8x512xbf16>
    %c3_71 = arith.constant 3 : index
    %c0_72 = arith.constant 0 : index
    %c0_73 = arith.constant 0 : index
    %170 = vector.load %arg4[%c3_71, %c0_72, %c0_73] : memref<9x8x8xbf16, #tpu.memory_space<vmem>>, vector<1x8x8xbf16>
    %171 = vector.shape_cast %170 : vector<1x8x8xbf16> to vector<8x8xbf16>
    %cst_74 = arith.constant dense<0.000000e+00> : vector<8x512xf32>
    %172 = tpu.matmul %171, %169, %cst_74 {dimension_numbers = #tpu.dot_dimension_numbers<[1], [0], [0], [1], [0, 0, 1, 1], [], []>} : vector<8x8xbf16>, vector<8x512xbf16>, vector<8x512xf32> -> vector<8x512xf32>
    %173 = arith.addf %163, %172 : vector<8x512xf32>
    %174 = arith.truncf %134 : vector<8x512xf32> to vector<8x512xbf16>
    %c4_75 = arith.constant 4 : index
    %c0_76 = arith.constant 0 : index
    %c0_77 = arith.constant 0 : index
    %175 = vector.load %arg4[%c4_75, %c0_76, %c0_77] : memref<9x8x8xbf16, #tpu.memory_space<vmem>>, vector<1x8x8xbf16>
    %176 = vector.shape_cast %175 : vector<1x8x8xbf16> to vector<8x8xbf16>
    %cst_78 = arith.constant dense<0.000000e+00> : vector<8x512xf32>
    %177 = tpu.matmul %176, %174, %cst_78 {dimension_numbers = #tpu.dot_dimension_numbers<[1], [0], [0], [1], [0, 0, 1, 1], [], []>} : vector<8x8xbf16>, vector<8x512xbf16>, vector<8x512xf32> -> vector<8x512xf32>
    %178 = arith.addf %173, %177 : vector<8x512xf32>
    %c511_i32_79 = arith.constant 511 : i32
    %179 = tpu.dynamic_rotate %134 by %c511_i32_79 dim 1 : vector<8x512xf32>, i32 -> vector<8x512xf32>
    %cst_80 = arith.constant 0.000000e+00 : f32
    %180 = vector.shape_cast %41 : vector<1x512xi1> to vector<1x512xi1>
    %181 = vector.broadcast %180 : vector<1x512xi1> to vector<8x512xi1>
    %182 = vector.broadcast %cst_80 : f32 to vector<8x512xf32>
    %183 = arith.select %181, %179, %182 : vector<8x512xi1>, vector<8x512xf32>
    %184 = arith.truncf %183 : vector<8x512xf32> to vector<8x512xbf16>
    %c5_81 = arith.constant 5 : index
    %c0_82 = arith.constant 0 : index
    %c0_83 = arith.constant 0 : index
    %185 = vector.load %arg4[%c5_81, %c0_82, %c0_83] : memref<9x8x8xbf16, #tpu.memory_space<vmem>>, vector<1x8x8xbf16>
    %186 = vector.shape_cast %185 : vector<1x8x8xbf16> to vector<8x8xbf16>
    %cst_84 = arith.constant dense<0.000000e+00> : vector<8x512xf32>
    %187 = tpu.matmul %186, %184, %cst_84 {dimension_numbers = #tpu.dot_dimension_numbers<[1], [0], [0], [1], [0, 0, 1, 1], [], []>} : vector<8x8xbf16>, vector<8x512xbf16>, vector<8x512xf32> -> vector<8x512xf32>
    %188 = arith.addf %178, %187 : vector<8x512xf32>
    %c497_i32_85 = arith.constant 497 : i32
    %189 = tpu.dynamic_rotate %134 by %c497_i32_85 dim 1 : vector<8x512xf32>, i32 -> vector<8x512xf32>
    %cst_86 = arith.constant 0.000000e+00 : f32
    %190 = vector.shape_cast %44 : vector<1x512xi1> to vector<1x512xi1>
    %191 = vector.broadcast %190 : vector<1x512xi1> to vector<8x512xi1>
    %192 = vector.broadcast %cst_86 : f32 to vector<8x512xf32>
    %193 = arith.select %191, %189, %192 : vector<8x512xi1>, vector<8x512xf32>
    %194 = arith.truncf %193 : vector<8x512xf32> to vector<8x512xbf16>
    %c6_87 = arith.constant 6 : index
    %c0_88 = arith.constant 0 : index
    %c0_89 = arith.constant 0 : index
    %195 = vector.load %arg4[%c6_87, %c0_88, %c0_89] : memref<9x8x8xbf16, #tpu.memory_space<vmem>>, vector<1x8x8xbf16>
    %196 = vector.shape_cast %195 : vector<1x8x8xbf16> to vector<8x8xbf16>
    %cst_90 = arith.constant dense<0.000000e+00> : vector<8x512xf32>
    %197 = tpu.matmul %196, %194, %cst_90 {dimension_numbers = #tpu.dot_dimension_numbers<[1], [0], [0], [1], [0, 0, 1, 1], [], []>} : vector<8x8xbf16>, vector<8x512xbf16>, vector<8x512xf32> -> vector<8x512xf32>
    %198 = arith.addf %188, %197 : vector<8x512xf32>
    %c496_i32_91 = arith.constant 496 : i32
    %199 = tpu.dynamic_rotate %134 by %c496_i32_91 dim 1 : vector<8x512xf32>, i32 -> vector<8x512xf32>
    %cst_92 = arith.constant 0.000000e+00 : f32
    %200 = vector.shape_cast %37 : vector<1x512xi1> to vector<1x512xi1>
    %201 = vector.broadcast %200 : vector<1x512xi1> to vector<8x512xi1>
    %202 = vector.broadcast %cst_92 : f32 to vector<8x512xf32>
    %203 = arith.select %201, %199, %202 : vector<8x512xi1>, vector<8x512xf32>
    %204 = arith.truncf %203 : vector<8x512xf32> to vector<8x512xbf16>
    %c7_93 = arith.constant 7 : index
    %c0_94 = arith.constant 0 : index
    %c0_95 = arith.constant 0 : index
    %205 = vector.load %arg4[%c7_93, %c0_94, %c0_95] : memref<9x8x8xbf16, #tpu.memory_space<vmem>>, vector<1x8x8xbf16>
    %206 = vector.shape_cast %205 : vector<1x8x8xbf16> to vector<8x8xbf16>
    %cst_96 = arith.constant dense<0.000000e+00> : vector<8x512xf32>
    %207 = tpu.matmul %206, %204, %cst_96 {dimension_numbers = #tpu.dot_dimension_numbers<[1], [0], [0], [1], [0, 0, 1, 1], [], []>} : vector<8x8xbf16>, vector<8x512xbf16>, vector<8x512xf32> -> vector<8x512xf32>
    %208 = arith.addf %198, %207 : vector<8x512xf32>
    %c495_i32_97 = arith.constant 495 : i32
    %209 = tpu.dynamic_rotate %134 by %c495_i32_97 dim 1 : vector<8x512xf32>, i32 -> vector<8x512xf32>
    %cst_98 = arith.constant 0.000000e+00 : f32
    %210 = vector.shape_cast %45 : vector<1x512xi1> to vector<1x512xi1>
    %211 = vector.broadcast %210 : vector<1x512xi1> to vector<8x512xi1>
    %212 = vector.broadcast %cst_98 : f32 to vector<8x512xf32>
    %213 = arith.select %211, %209, %212 : vector<8x512xi1>, vector<8x512xf32>
    %214 = arith.truncf %213 : vector<8x512xf32> to vector<8x512xbf16>
    %c8_99 = arith.constant 8 : index
    %c0_100 = arith.constant 0 : index
    %c0_101 = arith.constant 0 : index
    %215 = vector.load %arg4[%c8_99, %c0_100, %c0_101] : memref<9x8x8xbf16, #tpu.memory_space<vmem>>, vector<1x8x8xbf16>
    %216 = vector.shape_cast %215 : vector<1x8x8xbf16> to vector<8x8xbf16>
    %cst_102 = arith.constant dense<0.000000e+00> : vector<8x512xf32>
    %217 = tpu.matmul %216, %214, %cst_102 {dimension_numbers = #tpu.dot_dimension_numbers<[1], [0], [0], [1], [0, 0, 1, 1], [], []>} : vector<8x8xbf16>, vector<8x512xbf16>, vector<8x512xf32> -> vector<8x512xf32>
    %218 = arith.addf %208, %217 : vector<8x512xf32>
    %c0_103 = arith.constant 0 : index
    %c0_104 = arith.constant 0 : index
    %219 = vector.load %arg5[%c0_103, %c0_104] : memref<8x1xf32, #tpu.memory_space<vmem>>, vector<8x1xf32>
    %220 = vector.broadcast %219 : vector<8x1xf32> to vector<8x512xf32>
    %221 = arith.addf %218, %220 : vector<8x512xf32>
    %222 = arith.addf %221, %0 : vector<8x512xf32>
    %c0_105 = arith.constant 0 : index
    %c0_106 = arith.constant 0 : index
    %223 = vector.load %arg6[%c0_105, %c0_106] : memref<8x512xf32, #tpu.memory_space<vmem>>, vector<8x512xf32>
    tpu.vector_store %arg6[%c0_105, %c0_106], %222 {strides = array<i32>} : memref<8x512xf32, #tpu.memory_space<vmem>>, vector<8x512xf32>,
    return
  }
  func.func @transform_0(%arg0: i32) -> (i32, i32) {
    %c0_i32 = arith.constant 0 : i32
    %c0_i32_0 = arith.constant 0 : i32
    return %c0_i32, %arg0 : i32, i32
  }
  func.func @transform_1(%arg0: i32) -> (i32, i32, i32) {
    %c0_i32 = arith.constant 0 : i32
    %c0_i32_0 = arith.constant 0 : i32
    %c0_i32_1 = arith.constant 0 : i32
    %c0_i32_2 = arith.constant 0 : i32
    return %c0_i32, %c0_i32_0, %c0_i32_1 : i32, i32, i32
  }
  func.func @transform_2(%arg0: i32) -> (i32, i32) {
    %c0_i32 = arith.constant 0 : i32
    %c0_i32_0 = arith.constant 0 : i32
    %c0_i32_1 = arith.constant 0 : i32
    return %c0_i32, %c0_i32_0 : i32, i32
  }
  func.func @transform_3(%arg0: i32) -> (i32, i32, i32) {
    %c0_i32 = arith.constant 0 : i32
    %c0_i32_0 = arith.constant 0 : i32
    %c0_i32_1 = arith.constant 0 : i32
    %c0_i32_2 = arith.constant 0 : i32
    return %c0_i32, %c0_i32_0, %c0_i32_1 : i32, i32, i32
  }
  func.func @transform_4(%arg0: i32) -> (i32, i32) {
    %c0_i32 = arith.constant 0 : i32
    %c0_i32_0 = arith.constant 0 : i32
    %c0_i32_1 = arith.constant 0 : i32
    return %c0_i32, %c0_i32_0 : i32, i32
  }
  func.func @transform_5(%arg0: i32) -> (i32, i32) {
    %c0_i32 = arith.constant 0 : i32
    %c0_i32_0 = arith.constant 0 : i32
    return %c0_i32, %arg0 : i32, i32
  }
}

</mosaic_0001>

<bundles_post_ra>
// kernel: residual_block.1
= control target key start
LH: loop header
LB: loop body
LE: loop exit
PB: predicated region body
PF: predicated region fallthrough
CT: control target
= control target key end

     0   :  { %s2694_s26 = smov 16   ;;  %s2695_s27 = smov 17   ;;  %v3435_v6 = vmov 0   ;;  %v25_v8 = vlaneseq  ;;  %vm3430_vm3 = vcmask 1043456   ;;  %vm3432_vm12 = vcmask 64512   ;;  %s3410_s0 = inlined_call_operand.vmem [shape: f32[8,512], index: 0, kind: input, shape index: {}]   ;;  %s3411_s2 = inlined_call_operand.vmem [shape: f32[8,1], index: 2, kind: input, shape index: {}]   ;;  %s3412_s1 = inlined_call_operand.vmem [shape: bf16[9,8,8], index: 1, kind: input, shape index: {}]   ;;  %s3413_s4 = inlined_call_operand.vmem [shape: f32[8,1], index: 4, kind: input, shape index: {}]   ;;  %s3414_s3 = inlined_call_operand.vmem [shape: bf16[9,8,8], index: 3, kind: input, shape index: {}]   ;;  %s3415_s5 = inlined_call_operand.vmem [shape: f32[8,512], index: 5, kind: output, shape index: {}]  }
   0x1   :  { %v2736_v0 = vld [vmem:[%s3410_s0] sm:$0xff]  ;;  %v2741_v1 = vld [vmem:[%s3410_s0 + $0x8] sm:$0xff]  ;;  %v2746_v2 = vld [vmem:[%s3410_s0 + $0x10] sm:$0xff]  ;;  %268 = vmatprep.mubr.bf16.mxu0 %v3435_v6  ;;  %309 = vmatprep.mubr.bf16.mxu1 %v3435_v6  ;;  %s2697_s28 = smov 15   ;;  %s2698_s29 = smov 1  }
   0x2   :  { %v2529_v3 = vpack.i.bf16 %v2741_v1, %v2736_v0  ;;  %v2753_v4 = vld [vmem:[%s3410_s0 + $0x18] sm:$0xff]  ;;  %2609 = vset.pattern.permute.xlu0 %v3435_v6  ;;  %s2699_s30 = smov 127   ;;  %s2700_s6 = smov 113   ;;  %v1314_v7 = vld [vmem:[%s3411_s2] sm:$0xff]  ;;  %v2779_v9 = vand.u32 127, %v25_v8 }
   0x3   :  { %v2534_v5 = vpack.i.bf16 %v2753_v4, %v2746_v2  ;;  %s2701_s7 = smov 112   ;;  %s2702_s8 = smov 111  }
   0x4   :  { %2530 = vrot.lane.b32.xlu0 %v2529_v3, %s2694_s26  ;;  %2540 = vrot.lane.b32.xlu1 %v2529_v3, %s2695_s27  ;;  %v2782_v10 = vadd.s32 128, %v2779_v9  ;;  %v2786_v12 = vadd.s32 384, %v2779_v9  ;;  %v28_v13 = vadd.s32 256, %v2779_v9  ;;  %v34_v14 = vand.u32 255, %v2779_v9 }
   0x5   :  { %vm3418_vm0 = vcmp.lt.s32.totalorder %v2779_v9, 17  ;;  %vm3419_vm2 = vcmp.lt.s32.totalorder %v2779_v9, 16  ;;  %vm3420_vm6 = vcmp.lt.s32.totalorder %v2779_v9, 15 }
   0x6   :  { %v41_v11 = vand.u32 255, %v2782_v10  ;;  %v55_v16 = vand.u32 255, %v2786_v12  ;;  %v48_v17 = vand.u32 255, %v28_v13  ;;  %v2795_v18 = vand.u32 15, %v34_v14  ;;  %v2446_v10 = vld [vmem:[%s3412_s1 + $0xc] sm:$0xf] }
   0x7   :  { %vm2806_vm4 = vcmp.ge.s32.totalorder %v34_v14, 16 }
   0x8   :  { %2535 = vrot.lane.b32.xlu0 %v2534_v5, %s2694_s26  ;;  %2545 = vrot.lane.b32.xlu1 %v2534_v5, %s2695_s27  ;;  %v2792_v15 = vand.u32 15, %v41_v11  ;;  %v2802_v21 = vand.u32 15, %v55_v16  ;;  %v2804_v22 = vand.u32 15, %v48_v17  ;;  %vm3417_vm5 = vcmp.ge.s32.totalorder %v2795_v18, 1 }
   0x9   :  { %vm3427_vm7 = vcmp.le.s32.totalorder %v2795_v18, 14  ;;  %vm2817_vm8 = vcmp.ge.s32.totalorder %v48_v17, 16  ;;  %vm2832_vm14 = vmand %vm2806_vm4, %vm3417_vm5 }
   0xa   :  { %vm3416_vm1 = vcmp.ge.s32.totalorder %v2792_v15, 1  ;;  %vm3421_vm9 = vcmp.ge.s32.totalorder %v2802_v21, 1  ;;  %vm3426_vm10 = vcmp.ge.s32.totalorder %v2804_v22, 1  ;;  %vm3425_vm11 = vcmp.le.s32.totalorder %v2792_v15, 14 }
   0xb   :  { %vm3429_vm13 = vcmp.le.s32.totalorder %v2804_v22, 14  ;;  %vm3424_vm15 = vcmp.le.s32.totalorder %v2802_v21, 14  ;;  %vm2850_vm5 = vmand %vm2817_vm8, %vm3426_vm10 }
   0xc   :  { %2555 = vrot.lane.b32.xlu1 %v2534_v5, %s2697_s28  ;;  %2550 = vrot.lane.b32.xlu0 %v2529_v3, %s2697_s28 }
  0x10   :  { %2565 = vrot.lane.b32.xlu1 %v2534_v5, %s2698_s29  ;;  %2560 = vrot.lane.b32.xlu0 %v2529_v3, %s2698_s29 }
  0x14   :  { %2575 = vrot.lane.b32.xlu1 %v2534_v5, %s2699_s30  ;;  %2570 = vrot.lane.b32.xlu0 %v2529_v3, %s2699_s30 }
  0x18   :  { %2585 = vrot.lane.b32.xlu1 %v2534_v5, %s2700_s6  ;;  %2580 = vrot.lane.b32.xlu0 %v2529_v3, %s2700_s6 }
  0x1c   :  { %2595 = vrot.lane.b32.xlu1 %v2534_v5, %s2701_s7  ;;  %2590 = vrot.lane.b32.xlu0 %v2529_v3, %s2701_s7 }
  0x20   :  { %2605 = vrot.lane.b32.xlu1 %v2534_v5, %s2702_s8  ;;  %2600 = vrot.lane.b32.xlu0 %v2529_v3, %s2702_s8 }
  0x24   :  { %1317 = vperm.xlu0 %2609, %v1314_v7  }
  0x76   :  { %v2531_v19 = vpop.permute.xlu0 %2530  ;;  %v2541_v20 = vpop.permute.xlu1 %2540 }
  0x77   :  { %v2533_v23 = vunpack.i.h.bf16 %v2531_v19  ;;  %v2532_v24 = vunpack.i.l.bf16 %v2531_v19  ;;  %v2543_v25 = vunpack.i.h.bf16 %v2541_v20  ;;  %v2542_v26 = vunpack.i.l.bf16 %v2541_v20  ;;  %v2432_v19 = vld [vmem:[%s3412_s1 + $0x4] sm:$0xf] }
  0x79   :  { %v169_v28 = vsel %vm3418_vm0, %v2542_v26, %v2543_v25  ;;  %v199_v29 = vsel %vm3419_vm2, %v2532_v24, %v2533_v23 }
  0x7a   :  { %v180_v31 = vsel %vm3416_vm1, %v169_v28, 0.0  ;;  %v2536_v32 = vpop.permute.xlu0 %2535  ;;  %v214_v33 = vpack.c.bf16 %v199_v29, %v199_v29  ;;  %v2546_v34 = vpop.permute.xlu1 %2545  ;;  %vm3422_vm1 = vcmp.lt.s32.totalorder %v2779_v9, 1 }
  0x7b   :  { %v2538_v35 = vunpack.i.h.bf16 %v2536_v32  ;;  %v2537_v36 = vunpack.i.l.bf16 %v2536_v32  ;;  %v2548_v37 = vunpack.i.h.bf16 %v2546_v34  ;;  %v2547_v38 = vunpack.i.l.bf16 %v2546_v34 }
  0x7c   :  { %2433 = vmatprep.subr.msk.bf16.mxu0 %vm3430_vm3, %v214_v33  ;;  %v184_v39 = vpack.c.bf16 %v180_v31, %v180_v31 }
  0x7d   :  { %v167_v41 = vsel %vm3418_vm0, %v2547_v38, %v2548_v37  ;;  %v168_v42 = vsel %vm3418_vm0, %v2543_v25, %v2547_v38  ;;  %v170_v43 = vsel %vm3418_vm0, %v2548_v37, %v2542_v26  ;;  %v197_v44 = vsel %vm3419_vm2, %v2537_v36, %v2538_v35  ;;  %vm2876_vm0 = vmand %vm2806_vm4, %vm3427_vm7 }
  0x7e   :  { %v182_v46 = vsel %vm3421_vm9, %v167_v41, 0.0  ;;  %v216_v47 = vpack.c.bf16 %v197_v44, %v197_v44  ;;  %v200_v48 = vsel %vm3419_vm2, %v2538_v35, %v2532_v24  ;;  %v198_v49 = vsel %vm3419_vm2, %v2533_v23, %v2537_v36  ;;  %v2556_v50 = vpop.permute.xlu1 %2555  ;;  %v2551_v51 = vpop.permute.xlu0 %2550  ;;  %vm2892_vm2 = vmand %vm2817_vm8, %vm3429_vm13 }
  0x7f   :  { %v209_v52 = vsel %vm2806_vm4, %v200_v48, 0.0  ;;  %v211_v53 = vsel %vm2817_vm8, %v198_v49, 0.0  ;;  %v186_v54 = vpack.c.bf16 %v182_v46, %v182_v46  ;;  %v179_v55 = vsel %vm2832_vm14, %v170_v43, 0.0 }
  0x80   :  { %2435 = vmatprep.subr.msk.bf16.mxu1 %vm3430_vm3, %v216_v47  ;;  %v213_v56 = vpack.c.bf16 %v209_v52, %v209_v52  ;;  %v215_v57 = vpack.c.bf16 %v211_v53, %v211_v53  ;;  %v183_v58 = vpack.c.bf16 %v179_v55, %v179_v55  ;;  %v181_v59 = vsel %vm2850_vm5, %v168_v42, 0.0 }
  0x81   :  { %v185_v60 = vpack.c.bf16 %v181_v59, %v181_v59  ;;  %v2558_v61 = vunpack.i.h.bf16 %v2556_v50  ;;  %v2557_v62 = vunpack.i.l.bf16 %v2556_v50  ;;  %v2553_v63 = vunpack.i.h.bf16 %v2551_v51  ;;  %v187_v50 = vld [vmem:[%s3412_s1] sm:$0xf] }
  0x82   :  { %v225_v3 = vsel %vm3430_vm3, %v213_v56, 0  ;;  %v231_v5 = vsel %vm3430_vm3, %v215_v57, 0  ;;  %v322_v7 = vsel %vm3430_vm3, %v183_v58, 0  ;;  %v2552_v8 = vunpack.i.l.bf16 %v2551_v51  ;;  %v2566_v13 = vpop.permute.xlu1 %2565  ;;  %v2561_v14 = vpop.permute.xlu0 %2560 }
  0x83   :  { %251 = vmatpush1.bf16.msra.mxu0 %v225_v3  ;;  %292 = vmatpush1.bf16.msra.mxu1 %v231_v5  ;;  %v328_v20 = vsel %vm3430_vm3, %v185_v60, 0  ;;  %v424_v23 = vsel %vm3420_vm6, %v2557_v62, %v2558_v61  ;;  %v425_v24 = vsel %vm3420_vm6, %v2553_v63, %v2557_v62  ;;  %v2568_v25 = vunpack.i.h.bf16 %v2566_v13 }
  0x84   :  { %2437 = vmatprep.subr.msk.bf16.mxu0 %vm3430_vm3, %v184_v39  ;;  %2439 = vmatprep.subr.msk.bf16.mxu1 %vm3430_vm3, %v186_v54  ;;  %v439_v28 = vsel %vm3424_vm15, %v424_v23, 0.0  ;;  %v426_v29 = vsel %vm3420_vm6, %v2552_v8, %v2553_v63  ;;  %v427_v31 = vsel %vm3420_vm6, %v2558_v61, %v2552_v8  ;;  %v2567_v32 = vunpack.i.l.bf16 %v2566_v13  ;;  %v2441_v61 = vld [vmem:[%s3412_s1 + $0x8] sm:$0xf] }
  0x85   :  { %v437_v33 = vsel %vm3425_vm11, %v426_v29, 0.0  ;;  %v443_v34 = vpack.c.bf16 %v439_v28, %v439_v28  ;;  %v2563_v35 = vunpack.i.h.bf16 %v2561_v14  ;;  %v2562_v36 = vunpack.i.l.bf16 %v2561_v14 }
  0x86   :  { %2434 = vmatmul.mubr.msk.bf16.vlgmr.msra.gmra.mxu0 %vm3432_vm12, %v2432_v19  ;;  %2436 = vmatmul.mubr.msk.bf16.vlgmr.msra.gmra.mxu1 %vm3432_vm12, %v2432_v19  ;;  %v441_v37 = vpack.c.bf16 %v437_v33, %v437_v33  ;;  %v436_v38 = vsel %vm2876_vm0, %v427_v31, 0.0  ;;  %v438_v39 = vsel %vm2892_vm2, %v425_v24, 0.0  ;;  %v556_v41 = vsel %vm3422_vm1, %v2567_v32, %v2568_v25  ;;  %v2576_v59 = vpop.permute.xlu1 %2575  ;;  %v2571_v60 = vpop.permute.xlu0 %2570 }
  0x87   :  { %348 = vmatpush1.bf16.msra.mxu0 %v322_v7  ;;  %389 = vmatpush1.bf16.msra.mxu1 %v328_v20  ;;  %v558_v42 = vsel %vm3422_vm1, %v2562_v36, %v2563_v35  ;;  %v440_v43 = vpack.c.bf16 %v436_v38, %v436_v38  ;;  %v442_v44 = vpack.c.bf16 %v438_v39, %v438_v39  ;;  %v571_v46 = vsel %vm3421_vm9, %v556_v41, 0.0 }
  0x88   :  { %365 = vmatprep.mubr.bf16.mxu0 %v3435_v6  ;;  %406 = vmatprep.mubr.bf16.mxu1 %v3435_v6  ;;  %v557_v47 = vsel %vm3422_vm1, %v2563_v35, %v2567_v32  ;;  %v559_v48 = vsel %vm3422_vm1, %v2568_v25, %v2562_v36  ;;  %vm3450_vm6 = vcmp.ge.s32.totalorder %v2792_v15, 1  ;;  %v575_v54 = vpack.c.bf16 %v571_v46, %v571_v46 }
  0x89   :  { %2442 = vmatprep.subr.msk.bf16.mxu0 %vm3430_vm3, %v441_v37  ;;  %2444 = vmatprep.subr.msk.bf16.mxu1 %vm3430_vm3, %v443_v34  ;;  %v569_v49 = vsel %vm3450_vm6, %v558_v42, 0.0  ;;  %v450_v51 = vsel %vm3430_vm3, %v440_v43, 0  ;;  %v456_v52 = vsel %vm3430_vm3, %v442_v44, 0  ;;  %vm3451_vm9 = vcmp.ge.s32.totalorder %v2795_v18, 1 }
  0x8a   :  { %v573_v53 = vpack.c.bf16 %v569_v49, %v569_v49  ;;  %v568_v55 = vsel %vm3451_vm9, %v559_v48, 0.0  ;;  %v570_v56 = vsel %vm3426_vm10, %v557_v47, 0.0  ;;  %v2578_v62 = vunpack.i.h.bf16 %v2576_v59  ;;  %v2586_v23 = vpop.permute.xlu1 %2585  ;;  %v2581_v24 = vpop.permute.xlu0 %2580 }
  0x8b   :  { %v572_v57 = vpack.c.bf16 %v568_v55, %v568_v55  ;;  %v574_v58 = vpack.c.bf16 %v570_v56, %v570_v56  ;;  %v2577_v63 = vunpack.i.l.bf16 %v2576_v59  ;;  %v2573_v3 = vunpack.i.h.bf16 %v2571_v60 }
  0x8c   :  { %v2572_v5 = vunpack.i.l.bf16 %v2571_v60  ;;  %vm3423_vm6 = vcmp.lt.s32.totalorder %v2779_v9, 127  ;;  %v680_v13 = vpack.c.bf16 %v2741_v1, %v2741_v1  ;;  %v682_v14 = vpack.c.bf16 %v2753_v4, %v2753_v4 }
  0x8d   :  { %v582_v7 = vsel %vm3430_vm3, %v572_v57, 0  ;;  %v588_v8 = vsel %vm3430_vm3, %v574_v58, 0  ;;  %v796_v19 = vsel %vm3423_vm6, %v2573_v3, %v2577_v63  ;;  %v679_v1 = vpack.c.bf16 %v2736_v0, %v2736_v0 }
  0x8e   :  { %2438 = vmatmul.mubr.msk.bf16.vlgmr.msra.gmra.mxu0 %vm3432_vm12, %v187_v50  ;;  %2440 = vmatmul.mubr.msk.bf16.vlgmr.msra.gmra.mxu1 %vm3432_vm12, %v187_v50  ;;  %v798_v20 = vsel %vm3423_vm6, %v2578_v62, %v2572_v5  ;;  %v681_v4 = vpack.c.bf16 %v2746_v2, %v2746_v2  ;;  %vm2969_vm9 = vcmp.lt.s32.totalorder %v41_v11, 240  ;;  %v3452_v25 = vmov 0  ;;  %v2596_v47 = vpop.permute.xlu1 %2595  ;;  %v2591_v48 = vpop.permute.xlu0 %2590 }
  0x8f   :  { %476 = vmatpush1.bf16.msra.mxu0 %v450_v51  ;;  %517 = vmatpush1.bf16.msra.mxu1 %v456_v52  ;;  %v3453_v25 = vsel %vm2969_vm9, 4294967295, %v3452_v25  ;;  %v795_v28 = vsel %vm3423_vm6, %v2577_v63, %v2578_v62  ;;  %v808_v0 = vsel %vm3425_vm11, %v796_v19, 0.0  ;;  %v797_v2 = vsel %vm3423_vm6, %v2572_v5, %v2573_v3 }
  0x90   :  { %493 = vmatprep.mubr.bf16.mxu0 %v3435_v6  ;;  %534 = vmatprep.mubr.bf16.mxu1 %v3435_v6  ;;  %v810_v29 = vsel %vm3424_vm15, %v798_v20, 0.0  ;;  %v2588_v11 = vunpack.i.h.bf16 %v2586_v23  ;;  %v2587_v31 = vunpack.i.l.bf16 %v2586_v23  ;;  %v2583_v32 = vunpack.i.h.bf16 %v2581_v24 }
  0x91   :  { %2447 = vmatprep.subr.msk.bf16.mxu0 %vm3430_vm3, %v573_v53  ;;  %2449 = vmatprep.subr.msk.bf16.mxu1 %vm3430_vm3, %v575_v54  ;;  %v2582_v33 = vunpack.i.l.bf16 %v2581_v24  ;;  %v689_v34 = vsel %vm3430_vm3, %v679_v1, 0  ;;  %v695_v35 = vsel %vm3430_vm3, %v681_v4, 0  ;;  %vm3428_vm1 = vcmp.lt.s32.totalorder %v2779_v9, 113  ;;  %v2451_v53 = vld [vmem:[%s3412_s1 + $0x10] sm:$0xf] }
  0x92   :  { %vm2989_vm6 = vcmp.lt.s32.totalorder %v55_v16, 240  ;;  %v812_v37 = vpack.c.bf16 %v808_v0, %v808_v0  ;;  %v814_v38 = vpack.c.bf16 %v810_v29, %v810_v29  ;;  %v807_v39 = vsel %vm3427_vm7, %v797_v2, 0.0  ;;  %v2456_v1 = vld [vmem:[%s3412_s1 + $0x14] sm:$0xf] }
  0x93   :  { %v809_v41 = vsel %vm3429_vm13, %v795_v28, 0.0  ;;  %vm3456_vm15 = vcmp.ge.s32.totalorder %v2792_v15, 1  ;;  %vm3459_vm10 = vcmp.ge.s32.totalorder %v2802_v21, 1  ;;  %v928_v42 = vsel %vm3428_vm1, %v2583_v32, %v2587_v31 }
  0x94   :  { %vm3003_vm11 = vmand %vm2969_vm9, %vm3456_vm15  ;;  %v930_v43 = vsel %vm3428_vm1, %v2588_v11, %v2582_v33  ;;  %v811_v44 = vpack.c.bf16 %v807_v39, %v807_v39  ;;  %v813_v46 = vpack.c.bf16 %v809_v41, %v809_v41  ;;  %v927_v49 = vsel %vm3428_vm1, %v2587_v31, %v2588_v11 }
  0x95   :  { %vm3011_vm7 = vmand %vm2989_vm6, %vm3459_vm10  ;;  %v940_v50 = vsel %vm3003_vm11, %v928_v42, 0.0  ;;  %v929_v51 = vsel %vm3428_vm1, %v2582_v33, %v2583_v32  ;;  %v2598_v54 = vunpack.i.h.bf16 %v2596_v47  ;;  %v2597_v55 = vunpack.i.l.bf16 %v2596_v47 }
  0x96   :  { %2443 = vmatmul.mubr.msk.bf16.vlgmr.msra.gmra.mxu0 %vm3432_vm12, %v2441_v61  ;;  %2445 = vmatmul.mubr.msk.bf16.vlgmr.msra.gmra.mxu1 %vm3432_vm12, %v2441_v61  ;;  %v942_v52 = vsel %vm3011_vm7, %v930_v43, 0.0  ;;  %v2593_v56 = vunpack.i.h.bf16 %v2591_v48  ;;  %v2592_v57 = vunpack.i.l.bf16 %v2591_v48  ;;  %v821_v58 = vsel %vm3430_vm3, %v811_v44, 0  ;;  %v2461_v44 = vld [vmem:[%s3412_s1 + $0x18] sm:$0xf] }
  0x97   :  { %608 = vmatpush1.bf16.msra.mxu0 %v582_v7  ;;  %649 = vmatpush1.bf16.msra.mxu1 %v588_v8  ;;  %v827_v59 = vsel %vm3430_vm3, %v813_v46, 0  ;;  %vm3431_vm10 = vcmp.lt.s32.totalorder %v2779_v9, 112  ;;  %v944_v60 = vpack.c.bf16 %v940_v50, %v940_v50  ;;  %v946_v61 = vpack.c.bf16 %v942_v52, %v942_v52 }
  0x98   :  { %625 = vmatprep.mubr.bf16.mxu0 %v3435_v6  ;;  %666 = vmatprep.mubr.bf16.mxu1 %v3435_v6  ;;  %vm3462_vm15 = vcmp.ge.s32.totalorder %v2795_v18, 1  ;;  %vm3463_vm1 = vcmp.ge.s32.totalorder %v2804_v22, 1  ;;  %v1060_v3 = vsel %vm3431_vm10, %v2593_v56, %v2597_v55  ;;  %v1062_v5 = vsel %vm3431_vm10, %v2598_v54, %v2592_v57 }
  0x99   :  { %2452 = vmatprep.subr.msk.bf16.mxu0 %vm3430_vm3, %v680_v13  ;;  %2454 = vmatprep.subr.msk.bf16.mxu1 %vm3430_vm3, %v682_v14  ;;  %v939_v62 = vsel %vm3462_vm15, %v929_v51, 0.0  ;;  %v941_v63 = vsel %vm3463_vm1, %v927_v49, 0.0  ;;  %v2606_v13 = vpop.permute.xlu1 %2605  ;;  %v2601_v14 = vpop.permute.xlu0 %2600  ;;  %v1072_v19 = vsel %vm2969_vm9, %v1060_v3, 0.0  ;;  %v1074_v20 = vsel %vm2989_vm6, %v1062_v5, 0.0 }
  0x9a   :  { %v943_v7 = vpack.c.bf16 %v939_v62, %v939_v62  ;;  %v945_v8 = vpack.c.bf16 %v941_v63, %v941_v63  ;;  %v2608_v4 = vunpack.i.h.bf16 %v2606_v13  ;;  %v2607_v23 = vunpack.i.l.bf16 %v2606_v13 }
  0x9b   :  { %v2603_v24 = vunpack.i.h.bf16 %v2601_v14  ;;  %v2602_v28 = vunpack.i.l.bf16 %v2601_v14  ;;  %v1076_v29 = vpack.c.bf16 %v1072_v19, %v1072_v19  ;;  %v1061_v11 = vsel %vm3431_vm10, %v2592_v57, %v2593_v56  ;;  %v2471_v57 = vld [vmem:[%s3412_s1 + $0x20] sm:$0xf] }
  0x9c   :  { %v953_v0 = vsel %vm3430_vm3, %v943_v7, 0  ;;  %v959_v2 = vsel %vm3430_vm3, %v945_v8, 0  ;;  %v1059_v31 = vsel %vm3431_vm10, %v2597_v55, %v2598_v54  ;;  %vm3464_vm15 = vcmp.le.s32.totalorder %v2792_v15, 14  ;;  %v2466_v54 = vld [vmem:[%s3412_s1 + $0x1c] sm:$0xf] }
  0x9d   :  { %vm3071_vm13 = vmand %vm2969_vm9, %vm3464_vm15  ;;  %v3465_v32 = vmov 0  ;;  %vm3471_vm10 = vcmp.lt.s32.totalorder %v2779_v9, 111  ;;  %vm3473_vm15 = vcmask 1043456  }
  0x9e   :  { %2448 = vmatmul.mubr.msk.bf16.vlgmr.msra.gmra.mxu0 %vm3432_vm12, %v2446_v10  ;;  %2450 = vmatmul.mubr.msk.bf16.vlgmr.msra.gmra.mxu1 %vm3432_vm12, %v2446_v10  ;;  %v1078_v10 = vpack.c.bf16 %v1074_v20, %v1074_v20  ;;  %v3466_v32 = vsel %vm3071_vm13, 4294967295, %v3465_v32  ;;  %vm3474_vm9 = vmmov %vm3473_vm15 }
  0x9f   :  { %715 = vmatpush1.bf16.msra.mxu0 %v689_v34  ;;  %756 = vmatpush1.bf16.msra.mxu1 %v695_v35  ;;  %3467 = vst [vmem:[#allocation2_spill] sm:$0xff] %v3466_v32  ;;  %v1192_v34 = vsel %vm3471_vm10, %v2603_v24, %v2607_v23 }
  0xa0   :  { %732 = vmatprep.mubr.bf16.mxu0 %v3435_v6  ;;  %773 = vmatprep.mubr.bf16.mxu1 %v3435_v6  ;;  %v1204_v41 = vsel %vm3071_vm13, %v1192_v34, 0.0 }
  0xa1   :  { %2457 = vmatprep.subr.msk.bf16.mxu0 %vm3430_vm3, %v812_v37  ;;  %2459 = vmatprep.subr.msk.bf16.mxu1 %vm3430_vm3, %v814_v38  ;;  %v1075_v37 = vpack.c.bf16 %v1061_v11, %v1061_v11  ;;  %v1077_v38 = vpack.c.bf16 %v1059_v31, %v1059_v31  ;;  %v1208_v48 = vpack.c.bf16 %v1204_v41, %v1204_v41 }
  0xa6   :  { %2453 = vmatmul.mubr.msk.bf16.vlgmr.msra.gmra.mxu0 %vm3432_vm12, %v2451_v53  ;;  %2455 = vmatmul.mubr.msk.bf16.vlgmr.msra.gmra.mxu1 %vm3432_vm12, %v2451_v53 }
  0xa7   :  { %847 = vmatpush1.bf16.msra.mxu0 %v821_v58  ;;  %888 = vmatpush1.bf16.msra.mxu1 %v827_v59 }
  0xa8   :  { %864 = vmatprep.mubr.bf16.mxu0 %v3435_v6  ;;  %905 = vmatprep.mubr.bf16.mxu1 %v3435_v6 }
  0xa9   :  { %2462 = vmatprep.subr.msk.bf16.mxu0 %vm3430_vm3, %v944_v60  ;;  %2464 = vmatprep.subr.msk.bf16.mxu1 %vm3430_vm3, %v946_v61  ;;  %vm3468_vm3 = vcmp.le.s32.totalorder %v2802_v21, 14 }
  0xaa   :  { %vm3079_vm1 = vmand %vm2989_vm6, %vm3468_vm3 }
  0xab   :  { %vm3475_vm3 = vmmov %vm3471_vm10 }
  0xac   :  { %v1191_v39 = vsel %vm3475_vm3, %v2607_v23, %v2608_v4 }
  0xae   :  { %2458 = vmatmul.mubr.msk.bf16.vlgmr.msra.gmra.mxu0 %vm3432_vm12, %v2456_v1  ;;  %2460 = vmatmul.mubr.msk.bf16.vlgmr.msra.gmra.mxu1 %vm3432_vm12, %v2456_v1  ;;  %vm3472_vm12 = vmmov %vm3471_vm10 }
  0xaf   :  { %979 = vmatpush1.bf16.msra.mxu0 %v953_v0  ;;  %1020 = vmatpush1.bf16.msra.mxu1 %v959_v2  ;;  %v1194_v35 = vsel %vm3472_vm12, %v2608_v4, %v2602_v28  ;;  %vm3476_vm10 = vmmov %vm3475_vm3  ;;  %vm3480_vm3 = vcmp.le.s32.totalorder %v2804_v22, 14 }
  0xb0   :  { %996 = vmatprep.mubr.bf16.mxu0 %v3435_v6  ;;  %1037 = vmatprep.mubr.bf16.mxu1 %v3435_v6  ;;  %v1193_v42 = vsel %vm3476_vm10, %v2602_v28, %v2603_v24  ;;  %v1206_v43 = vsel %vm3079_vm1, %v1194_v35, 0.0  ;;  %vm3477_vm12 = vmmov %vm3474_vm9  ;;  %v1205_v51 = vsel %vm3480_vm3, %v1191_v39, 0.0  ;;  %vm3481_vm10 = vcmask 64512  }
  0xb1   :  { %2467 = vmatprep.subr.msk.bf16.mxu0 %vm3473_vm15, %v1076_v29  ;;  %2469 = vmatprep.subr.msk.bf16.mxu1 %vm3474_vm9, %v1078_v10  ;;  %v1085_v46 = vsel %vm3477_vm12, %v1075_v37, 0  ;;  %vm3478_vm15 = vmmov %vm3474_vm9  ;;  %v1210_v49 = vpack.c.bf16 %v1206_v43, %v1206_v43  ;;  %vm3479_vm9 = vcmp.le.s32.totalorder %v2795_v18, 14  ;;  %v1209_v53 = vpack.c.bf16 %v1205_v51, %v1205_v51 }
  0xb2   :  { %v1091_v47 = vsel %vm3478_vm15, %v1077_v38, 0  ;;  %v1203_v50 = vsel %vm3479_vm9, %v1193_v42, 0.0  ;;  %vm3482_vm13 = vmmov %vm3481_vm10 }
  0xb3   :  { %v1207_v52 = vpack.c.bf16 %v1203_v50, %v1203_v50  ;;  %vm3483_vm15 = vmmov %vm3477_vm12 }
  0xb4   :  { %vm3484_vm9 = vmmov %vm3477_vm12 }
  0xb5   :  { %v1217_v55 = vsel %vm3484_vm9, %v1207_v52, 0  ;;  %vm3485_vm3 = vmmov %vm3484_vm9  ;;  %vm3489_vm9 = vcmp.lt.s32.totalorder %v2779_v9, 16 }
  0xb6   :  { %2463 = vmatmul.mubr.msk.bf16.vlgmr.msra.gmra.mxu0 %vm3481_vm10, %v2461_v44  ;;  %2465 = vmatmul.mubr.msk.bf16.vlgmr.msra.gmra.mxu1 %vm3482_vm13, %v2461_v44  ;;  %v1223_v56 = vsel %vm3485_vm3, %v1209_v53, 0  ;;  %vm3486_vm13 = vmmov %vm3481_vm10  ;;  %vm3490_vm3 = vcmp.lt.s32.totalorder %v2779_v9, 17 }
  0xb7   :  { %1111 = vmatpush1.bf16.msra.mxu0 %v1085_v46  ;;  %1152 = vmatpush1.bf16.msra.mxu1 %v1091_v47 }
  0xb8   :  { %1128 = vmatprep.mubr.bf16.mxu0 %v3435_v6  ;;  %1169 = vmatprep.mubr.bf16.mxu1 %v3435_v6 }
  0xb9   :  { %2472 = vmatprep.subr.msk.bf16.mxu0 %vm3477_vm12, %v1208_v48  ;;  %2474 = vmatprep.subr.msk.bf16.mxu1 %vm3483_vm15, %v1210_v49  ;;  %vm3487_vm12 = vmmov %vm3481_vm10 }
  0xba   :  { %vm3488_vm15 = vmmov %vm3481_vm10 }
  0xbe   :  { %2468 = vmatmul.mubr.msk.bf16.vlgmr.msra.gmra.mxu0 %vm3486_vm13, %v2466_v54  ;;  %2470 = vmatmul.mubr.msk.bf16.vlgmr.msra.gmra.mxu1 %vm3481_vm10, %v2466_v54  ;;  %vm3491_vm13 = vcmask 1043456   ;;  %vm3492_vm10 = vmmov %vm3489_vm9 }
  0xbf   :  { %1243 = vmatpush1.bf16.msra.mxu0 %v1217_v55  ;;  %1284 = vmatpush1.bf16.msra.mxu1 %v1223_v56 }
  0xc0   :  { %1260 = vmatprep.mubr.bf16.mxu0 %v3435_v6  ;;  %1301 = vmatprep.mubr.bf16.mxu1 %v3435_v6 }
  0xc6   :  { %2473 = vmatmul.mubr.msk.bf16.vlgmr.msra.gmra.mxu0 %vm3487_vm12, %v2471_v57  ;;  %2475 = vmatmul.mubr.msk.bf16.vlgmr.msra.gmra.mxu1 %vm3488_vm15, %v2471_v57  ;;  %vm3493_vm12 = vmmov %vm3489_vm9 }
  0xc7   :  { %1418 = vmatprep.mubr.bf16.mxu0 %v3435_v6  ;;  %1459 = vmatprep.mubr.bf16.mxu1 %v3435_v6  ;;  %vm3494_vm15 = vmmov %vm3489_vm9 }
 0x146   :  { %v270_v58 = vpop.f32.mrf.mxu0  ;;  %v311_v59 = vpop.f32.mrf.mxu1 }
 0x148   :  { %v272_v60 = vpop.f32.mrf.mxu0  ;;  %v313_v61 = vpop.f32.mrf.mxu1 }
 0x14a   :  { %v274_v62 = vpop.f32.mrf.mxu0  ;;  %v315_v63 = vpop.f32.mrf.mxu1 }
 0x14c   :  { %v275_v3 = vpop.f32.mrf.mxu0  ;;  %v316_v5 = vpop.f32.mrf.mxu1 }
 0x14e   :  { %v367_v7 = vpop.f32.mrf.mxu0  ;;  %v408_v8 = vpop.f32.mrf.mxu1 }
 0x150   :  { %v369_v13 = vpop.f32.mrf.mxu0  ;;  %v410_v14 = vpop.f32.mrf.mxu1 }
 0x152   :  { %v371_v19 = vpop.f32.mrf.mxu0  ;;  %v412_v20 = vpop.f32.mrf.mxu1 }
 0x154   :  { %v372_v1 = vpop.f32.mrf.mxu0  ;;  %v413_v4 = vpop.f32.mrf.mxu1 }
 0x155   :  { %v368_v1 = vadd.f32 %v367_v7, %v270_v58 }
 0x156   :  { %v495_v23 = vpop.f32.mrf.mxu0  ;;  %v536_v24 = vpop.f32.mrf.mxu1 }
 0x158   :  { %v497_v28 = vpop.f32.mrf.mxu0  ;;  %v538_v0 = vpop.f32.mrf.mxu1 }
 0x15a   :  { %v499_v2 = vpop.f32.mrf.mxu0  ;;  %v540_v29 = vpop.f32.mrf.mxu1 }
 0x15b   :  { %v409_v29 = vadd.f32 %v408_v8, %v311_v59 }
 0x15c   :  { %v500_v10 = vpop.f32.mrf.mxu0  ;;  %v541_v11 = vpop.f32.mrf.mxu1 }
 0x15d   :  { %v370_v10 = vadd.f32 %v369_v13, %v272_v60  ;;  %v411_v11 = vadd.f32 %v410_v14, %v313_v61 }
 0x15e   :  { %v627_v31 = vpop.f32.mrf.mxu0  ;;  %v668_v34 = vpop.f32.mrf.mxu1 }
 0x160   :  { %v629_v35 = vpop.f32.mrf.mxu0  ;;  %v670_v37 = vpop.f32.mrf.mxu1 }
 0x162   :  { %v631_v38 = vpop.f32.mrf.mxu0  ;;  %v672_v39 = vpop.f32.mrf.mxu1 }
 0x163   :  { %v543_v38 = vadd.f32 %v495_v23, %v368_v1 }
 0x164   :  { %v632_v41 = vpop.f32.mrf.mxu0  ;;  %v673_v42 = vpop.f32.mrf.mxu1 }
 0x165   :  { %v545_v42 = vadd.f32 %v536_v24, %v409_v29 }
 0x166   :  { %v734_v43 = vpop.f32.mrf.mxu0  ;;  %v775_v44 = vpop.f32.mrf.mxu1 }
 0x168   :  { %v736_v46 = vpop.f32.mrf.mxu0  ;;  %v777_v47 = vpop.f32.mrf.mxu1 }
 0x16a   :  { %v738_v48 = vpop.f32.mrf.mxu0  ;;  %v779_v49 = vpop.f32.mrf.mxu1 }
 0x16b   :  { %v544_v48 = vadd.f32 %v497_v28, %v370_v10  ;;  %v546_v49 = vadd.f32 %v538_v0, %v411_v11 }
 0x16c   :  { %v739_v50 = vpop.f32.mrf.mxu0  ;;  %v780_v51 = vpop.f32.mrf.mxu1 }
 0x16d   :  { %v675_v50 = vadd.f32 %v627_v31, %v543_v38 }
 0x16e   :  { %v866_v52 = vpop.f32.mrf.mxu0  ;;  %v907_v53 = vpop.f32.mrf.mxu1 }
 0x16f   :  { %v782_v6 = vadd.f32 %v734_v43, %v675_v50 }
 0x170   :  { %v868_v54 = vpop.f32.mrf.mxu0  ;;  %v909_v55 = vpop.f32.mrf.mxu1 }
 0x171   :  { %v914_v60 = vadd.f32 %v866_v52, %v782_v6 }
 0x172   :  { %v870_v56 = vpop.f32.mrf.mxu0  ;;  %v911_v57 = vpop.f32.mrf.mxu1 }
 0x173   :  { %v677_v57 = vadd.f32 %v668_v34, %v545_v42 }
 0x174   :  { %v871_v62 = vpop.f32.mrf.mxu0  ;;  %v912_v63 = vpop.f32.mrf.mxu1 }
 0x175   :  { %v676_v62 = vadd.f32 %v629_v35, %v544_v48  ;;  %v678_v63 = vadd.f32 %v670_v37, %v546_v49  ;;  %v784_v7 = vadd.f32 %v775_v44, %v677_v57  ;;  %v1318_v37 = vpop.permute.xlu0 %1317 }
 0x176   :  { %v998_v3 = vpop.f32.mrf.mxu0  ;;  %v1039_v5 = vpop.f32.mrf.mxu1 }
 0x177   :  { %v785_v59 = vadd.f32 %v777_v47, %v678_v63  ;;  %v916_v13 = vadd.f32 %v907_v53, %v784_v7  ;;  %v1046_v24 = vadd.f32 %v998_v3, %v914_v60 }
 0x178   :  { %v1000_v19 = vpop.f32.mrf.mxu0  ;;  %v1041_v20 = vpop.f32.mrf.mxu1 }
 0x179   :  { %v917_v23 = vadd.f32 %v909_v55, %v785_v59  ;;  %v1048_v31 = vadd.f32 %v1039_v5, %v916_v13 }
 0x17a   :  { %v1002_v4 = vpop.f32.mrf.mxu0  ;;  %v1043_v2 = vpop.f32.mrf.mxu1 }
 0x17b   :  { %v783_v4 = vadd.f32 %v736_v46, %v676_v62  ;;  %v1049_v34 = vadd.f32 %v1041_v20, %v917_v23 }
 0x17c   :  { %v1003_v39 = vpop.f32.mrf.mxu0  ;;  %v1044_v41 = vpop.f32.mrf.mxu1 }
 0x17d   :  { %v915_v14 = vadd.f32 %v868_v54, %v783_v4 }
 0x17e   :  { %v1130_v51 = vpop.f32.mrf.mxu0  ;;  %v1171_v56 = vpop.f32.mrf.mxu1 }
 0x17f   :  { %v1047_v1 = vadd.f32 %v1000_v19, %v915_v14  ;;  %v1178_v35 = vadd.f32 %v1130_v51, %v1046_v24  ;;  %v1180_v29 = vadd.f32 %v1171_v56, %v1048_v31  ;;  %v2410_v51 = vld [vmem:[%s3413_s4] sm:$0xff] }
 0x180   :  { %v1132_v32 = vpop.f32.mrf.mxu0  ;;  %v1173_v58 = vpop.f32.mrf.mxu1 }
 0x181   :  { %v1179_v44 = vadd.f32 %v1132_v32, %v1047_v1  ;;  %v1181_v46 = vadd.f32 %v1173_v58, %v1049_v34 }
 0x182   :  { %v1134_v61 = vpop.f32.mrf.mxu0  ;;  %v1175_v8 = vpop.f32.mrf.mxu1 }
 0x184   :  { %v1135_v28 = vpop.f32.mrf.mxu0  ;;  %v1176_v0 = vpop.f32.mrf.mxu1 }
 0x186   :  { %v1262_v43 = vpop.f32.mrf.mxu0  ;;  %v1303_v2 = vpop.f32.mrf.mxu1 }
 0x187   :  { %v1310_v47 = vadd.f32 %v1262_v43, %v1178_v35  ;;  %v1312_v10 = vadd.f32 %v1303_v2, %v1180_v29 }
 0x188   :  { %v1264_v6 = vpop.f32.mrf.mxu0  ;;  %v1305_v52 = vpop.f32.mrf.mxu1 }
 0x189   :  { %v1320_v53 = vadd.f32 %v1318_v37, %v1310_v47  ;;  %v1311_v54 = vadd.f32 %v1264_v6, %v1179_v44  ;;  %v1313_v55 = vadd.f32 %v1305_v52, %v1181_v46  ;;  %v1322_v39 = vadd.f32 %v1318_v37, %v1312_v10 }
 0x18a   :  { %v1266_v3 = vpop.f32.mrf.mxu0  ;;  %v1307_v11 = vpop.f32.mrf.mxu1 }
 0x18b   :  { %v1321_v38 = vadd.f32 %v1318_v37, %v1311_v54  ;;  %v1323_v5 = vadd.f32 %v1318_v37, %v1313_v55  ;;  %v3130_v41 = vmax.f32 %v1320_v53, 0.0  ;;  %v3138_v49 = vmax.f32 %v1322_v39, 0.0 }
 0x18c   :  { %v1267_v19 = vpop.f32.mrf.mxu0  ;;  %v1308_v20 = vpop.f32.mrf.mxu1 }
 0x18d   :  { %v3132_v42 = vmax.f32 %v1321_v38, 0.0  ;;  %v3134_v32 = vmax.f32 %v1323_v5, 0.0  ;;  %v2476_v20 = vld [vmem:[%s3414_s3 + $0x4] sm:$0xf] }
 0x18f   :  { %v2620_v48 = vpack.i.bf16 %v3132_v42, %v3130_v41  ;;  %v2615_v50 = vpack.i.bf16 %v3134_v32, %v3138_v49 }
 0x191   :  { %2621 = vrot.lane.b32.xlu0 %v2620_v48, %s2695_s27  ;;  %2611 = vrot.lane.b32.xlu1 %v2620_v48, %s2694_s26 }
 0x195   :  { %2631 = vrot.lane.b32.xlu0 %v2620_v48, %s2697_s28  ;;  %2616 = vrot.lane.b32.xlu1 %v2615_v50, %s2694_s26 }
 0x199   :  { %2641 = vrot.lane.b32.xlu0 %v2620_v48, %s2698_s29  ;;  %2626 = vrot.lane.b32.xlu1 %v2615_v50, %s2695_s27 }
 0x19d   :  { %2651 = vrot.lane.b32.xlu0 %v2620_v48, %s2699_s30  ;;  %2636 = vrot.lane.b32.xlu1 %v2615_v50, %s2697_s28 }
 0x1a1   :  { %2661 = vrot.lane.b32.xlu0 %v2620_v48, %s2700_s6  ;;  %2646 = vrot.lane.b32.xlu1 %v2615_v50, %s2698_s29 }
 0x1a5   :  { %2671 = vrot.lane.b32.xlu0 %v2620_v48, %s2701_s7  ;;  %2656 = vrot.lane.b32.xlu1 %v2615_v50, %s2699_s30 }
 0x1a9   :  { %2681 = vrot.lane.b32.xlu0 %v2620_v48, %s2702_s8  ;;  %2666 = vrot.lane.b32.xlu1 %v2615_v50, %s2700_s6 }
 0x1ad   :  { %2413 = vperm.xlu0 %2609, %v2410_v51   ;;  %2676 = vrot.lane.b32.xlu1 %v2615_v50, %s2701_s7 }
 0x1b1   :  { %2686 = vrot.lane.b32.xlu1 %v2615_v50, %s2702_s8 }
 0x203   :  { %v2622_v56 = vpop.permute.xlu0 %2621  ;;  %v2612_v57 = vpop.permute.xlu1 %2611 }
 0x204   :  { %v2614_v62 = vunpack.i.h.bf16 %v2612_v57  ;;  %v2613_v63 = vunpack.i.l.bf16 %v2612_v57  ;;  %v2624_v58 = vunpack.i.h.bf16 %v2622_v56  ;;  %v2623_v7 = vunpack.i.l.bf16 %v2622_v56 }
 0x206   :  { %v1359_v4 = vsel %vm3489_vm9, %v2613_v63, %v2614_v62  ;;  %v1338_v14 = vsel %vm3490_vm3, %v2623_v7, %v2624_v58  ;;  %vm3495_vm9 = vcmp.ge.s32.totalorder %v2792_v15, 1  ;;  %vm3496_vm3 = vcmp.lt.s32.totalorder %v2779_v9, 15 }
 0x207   :  { %v1366_v59 = vpack.c.bf16 %v1359_v4, %v1359_v4  ;;  %v2632_v60 = vpop.permute.xlu0 %2631  ;;  %v2617_v61 = vpop.permute.xlu1 %2616  ;;  %v1341_v43 = vsel %vm3495_vm9, %v1338_v14, 0.0  ;;  %vm3502_vm9 = vmmov %vm3491_vm13 }
 0x208   :  { %v2619_v8 = vunpack.i.h.bf16 %v2617_v61  ;;  %v2618_v13 = vunpack.i.l.bf16 %v2617_v61  ;;  %v2634_v23 = vunpack.i.h.bf16 %v2632_v60  ;;  %v2633_v24 = vunpack.i.l.bf16 %v2632_v60 }
 0x209   :  { %2477 = vmatprep.subr.msk.bf16.mxu0 %vm3491_vm13, %v1366_v59  ;;  %v1345_v3 = vpack.c.bf16 %v1341_v43, %v1341_v43  ;;  %v3512_v60 = vmov 0  }
 0x20a   :  { %v1357_v28 = vsel %vm3492_vm10, %v2618_v13, %v2619_v8  ;;  %v1358_v0 = vsel %vm3493_vm12, %v2614_v62, %v2618_v13  ;;  %v1360_v31 = vsel %vm3494_vm15, %v2619_v8, %v2613_v63  ;;  %v1575_v44 = vsel %vm3496_vm3, %v2633_v24, %v2634_v23  ;;  %vm3501_vm15 = vmmov %vm3491_vm13 }
 0x20b   :  { %v1368_v1 = vpack.c.bf16 %v1357_v28, %v1357_v28  ;;  %v2627_v34 = vpop.permute.xlu1 %2626  ;;  %v1361_v35 = vsel %vm2806_vm4, %v1360_v31, 0.0  ;;  %v1363_v37 = vsel %vm2817_vm8, %v1358_v0, 0.0  ;;  %v2642_v46 = vpop.permute.xlu0 %2641  ;;  %vm3497_vm10 = vcmp.lt.s32.totalorder %v2779_v9, 17 }
 0x20c   :  { %v2629_v2 = vunpack.i.h.bf16 %v2627_v34  ;;  %v2628_v29 = vunpack.i.l.bf16 %v2627_v34  ;;  %v1365_v47 = vpack.c.bf16 %v1361_v35, %v1361_v35  ;;  %v1367_v6 = vpack.c.bf16 %v1363_v37, %v1363_v37  ;;  %vm3498_vm4 = vmmov %vm3497_vm10 }
 0x20d   :  { %2479 = vmatprep.subr.msk.bf16.mxu1 %vm3491_vm13, %v1368_v1  ;;  %vm3499_vm8 = vmmov %vm3498_vm4  ;;  %vm3500_vm12 = vcmp.ge.s32.totalorder %v2802_v21, 1  ;;  %vm3503_vm3 = vcmp.le.s32.totalorder %v2792_v15, 14  ;;  %v2644_v38 = vunpack.i.h.bf16 %v2642_v46  ;;  %v2643_v39 = vunpack.i.l.bf16 %v2642_v46  ;;  %v1348_v1 = vld [vmem:[%s3414_s3] sm:$0xf] }
 0x20e   :  { %v1339_v27 = vsel %vm3497_vm10, %v2629_v2, %v2623_v7  ;;  %v1336_v30 = vsel %vm3498_vm4, %v2628_v29, %v2629_v2  ;;  %v1337_v52 = vsel %vm3499_vm8, %v2624_v58, %v2628_v29  ;;  %v1375_v54 = vsel %vm3501_vm15, %v1365_v47, 0  ;;  %vm3504_vm13 = vmmov %vm3502_vm9 }
 0x20f   :  { %v1343_v10 = vsel %vm3500_vm12, %v1336_v30, 0.0  ;;  %v2637_v53 = vpop.permute.xlu1 %2636  ;;  %v1381_v55 = vsel %vm3502_vm9, %v1367_v6, 0  ;;  %v1578_v11 = vsel %vm3503_vm3, %v1575_v44, 0.0  ;;  %1401 = vmatpush1.bf16.msra.mxu0 %v1375_v54  ;;  %v1340_v50 = vsel %vm2832_vm14, %v1339_v27, 0.0  ;;  %v2652_v30 = vpop.permute.xlu0 %2651 }
 0x210   :  { %v2639_v5 = vunpack.i.h.bf16 %v2637_v53  ;;  %v2638_v19 = vunpack.i.l.bf16 %v2637_v53  ;;  %1442 = vmatpush1.bf16.msra.mxu1 %v1381_v55  ;;  %2481 = vmatprep.subr.msk.bf16.mxu0 %vm3504_vm13, %v1345_v3  ;;  %v1347_v48 = vpack.c.bf16 %v1343_v10, %v1343_v10  ;;  %v1342_v51 = vsel %vm2850_vm5, %v1337_v52, 0.0  ;;  %vm3511_vm5 = vmmov %vm3502_vm9  ;;  %v2485_v52 = vld [vmem:[%s3414_s3 + $0x8] sm:$0xf] }
 0x211   :  { %vm3505_vm10 = vcmp.lt.s32.totalorder %v2779_v9, 15  ;;  %vm3507_vm8 = vcmp.le.s32.totalorder %v2802_v21, 14  ;;  %vm3508_vm12 = vcmask 64512   ;;  %v1344_v58 = vpack.c.bf16 %v1340_v50, %v1340_v50  ;;  %vm3514_vm3 = vmmov %vm3511_vm5 }
 0x212   :  { %v1576_v56 = vsel %vm3505_vm10, %v2639_v5, %v2633_v24  ;;  %vm3506_vm4 = vmmov %vm3505_vm10  ;;  %2478 = vmatmul.mubr.msk.bf16.vlgmr.msra.gmra.mxu0 %vm3508_vm12, %v2476_v20  ;;  %v1346_v40 = vpack.c.bf16 %v1342_v51, %v1342_v51  ;;  %v1582_v7 = vpack.c.bf16 %v1578_v11, %v1578_v11  ;;  %2483 = vmatprep.subr.msk.bf16.mxu1 %vm3511_vm5, %v1347_v48  ;;  %vm3513_vm9 = vcmp.lt.s32.totalorder %v2779_v9, 1 }
 0x213   :  { %v1573_v57 = vsel %vm3506_vm4, %v2638_v19, %v2639_v5  ;;  %vm3509_vm15 = vmmov %vm3508_vm12  ;;  %v2647_v63 = vpop.permute.xlu1 %2646  ;;  %1515 = vmatprep.mubr.bf16.mxu0 %v3512_v60  ;;  %v1577_v61 = vsel %vm2876_vm0, %v1576_v56, 0.0  ;;  %v1698_v8 = vsel %vm3513_vm9, %v2643_v39, %v2644_v38  ;;  %v1472_v13 = vsel %vm3514_vm3, %v1344_v58, 0  ;;  %v2662_v48 = vpop.permute.xlu0 %2661  ;;  %v2490_v56 = vld [vmem:[%s3414_s3 + $0xc] sm:$0xf] }
 0x214   :  { %v1580_v62 = vsel %vm3507_vm8, %v1573_v57, 0.0  ;;  %2480 = vmatmul.mubr.msk.bf16.vlgmr.msra.gmra.mxu1 %vm3509_vm15, %v2476_v20  ;;  %vm3510_vm14 = vmmov %vm3506_vm4  ;;  %v2649_v4 = vunpack.i.h.bf16 %v2647_v63  ;;  %v2648_v59 = vunpack.i.l.bf16 %v2647_v63  ;;  %1498 = vmatpush1.bf16.msra.mxu0 %v1472_v13  ;;  %vm3517_vm4 = vcmp.ge.s32.totalorder %v2802_v21, 1 }
 0x215   :  { %v1574_v45 = vsel %vm3510_vm14, %v2634_v23, %v2638_v19  ;;  %vm3515_vm13 = vmmov %vm3514_vm3  ;;  %v1584_v24 = vpack.c.bf16 %v1580_v62, %v1580_v62  ;;  %1556 = vmatprep.mubr.bf16.mxu1 %v3512_v60  ;;  %v1581_v17 = vpack.c.bf16 %v1577_v61, %v1577_v61  ;;  %vm3519_vm0 = vcmp.ge.s32.totalorder %v2792_v15, 1 }
 0x216   :  { %v1478_v14 = vsel %vm3515_vm13, %v1346_v40, 0  ;;  %vm3516_vm10 = vmmov %vm3513_vm9  ;;  %v1579_v0 = vsel %vm2892_vm2, %v1574_v45, 0.0  ;;  %v1701_v31 = vsel %vm3519_vm0, %v1698_v8, 0.0  ;;  %vm3523_vm5 = vcmask 64512  }
 0x217   :  { %v1696_v23 = vsel %vm3516_vm10, %v2648_v59, %v2649_v4  ;;  %1539 = vmatpush1.bf16.msra.mxu1 %v1478_v14  ;;  %vm3518_vm8 = vmmov %vm3514_vm3  ;;  %v1583_v37 = vpack.c.bf16 %v1579_v0, %v1579_v0  ;;  %v1705_v29 = vpack.c.bf16 %v1701_v31, %v1701_v31  ;;  %vm3526_vm13 = vcmp.ge.s32.totalorder %v2795_v18, 1  ;;  %v2657_v47 = vpop.permute.xlu1 %2656  ;;  %v2672_v13 = vpop.permute.xlu0 %2671 }
 0x218   :  { %v1703_v28 = vsel %vm3517_vm4, %v1696_v23, 0.0  ;;  %2486 = vmatprep.subr.msk.bf16.mxu0 %vm3518_vm8, %v1582_v7  ;;  %vm3520_vm12 = vmmov %vm3514_vm3  ;;  %vm3527_vm10 = vcmp.ge.s32.totalorder %v2804_v22, 1  ;;  %v2659_v10 = vunpack.i.h.bf16 %v2657_v47  ;;  %v2658_v53 = vunpack.i.l.bf16 %v2657_v47 }
 0x219   :  { %2488 = vmatprep.subr.msk.bf16.mxu1 %vm3520_vm12, %v1584_v24  ;;  %vm3521_vm15 = vmmov %vm3513_vm9  ;;  %v1707_v43 = vpack.c.bf16 %v1703_v28, %v1703_v28  ;;  %v1597_v2 = vsel %vm3514_vm3, %v1583_v37, 0  ;;  %v1812_v54 = vpack.c.bf16 %v3132_v42, %v3132_v42  ;;  %v1814_v55 = vpack.c.bf16 %v3134_v32, %v3134_v32 }
 0x21a   :  { %v1699_v34 = vsel %vm3521_vm15, %v2649_v4, %v2643_v39  ;;  %vm3522_vm14 = vmmov %vm3513_vm9  ;;  %2482 = vmatmul.mubr.msk.bf16.vlgmr.msra.gmra.mxu0 %vm3523_vm5, %v1348_v1  ;;  %v2654_v3 = vunpack.i.h.bf16 %v2652_v30  ;;  %v2653_v11 = vunpack.i.l.bf16 %v2652_v30  ;;  %v1811_v20 = vpack.c.bf16 %v3130_v41, %v3130_v41 }
 0x21b   :  { %v1697_v35 = vsel %vm3522_vm14, %v2644_v38, %v2648_v59  ;;  %vm3524_vm2 = vmmov %vm3523_vm5  ;;  %v1700_v44 = vsel %vm3526_vm13, %v1699_v34, 0.0  ;;  %1634 = vmatprep.mubr.bf16.mxu0 %v3512_v60  ;;  %vm3534_vm5 = vcmp.lt.s32.totalorder %v2779_v9, 127  ;;  %v2667_v32 = vpop.permute.xlu1 %2666  ;;  %v1813_v39 = vpack.c.bf16 %v3138_v49, %v3138_v49 }
 0x21c   :  { %2484 = vmatmul.mubr.msk.bf16.vlgmr.msra.gmra.mxu1 %vm3524_vm2, %v1348_v1  ;;  %vm3525_vm9 = vmmov %vm3514_vm3  ;;  %v1702_v46 = vsel %vm3527_vm10, %v1697_v35, 0.0  ;;  %v1704_v6 = vpack.c.bf16 %v1700_v44, %v1700_v44  ;;  %v1929_v19 = vsel %vm3534_vm5, %v2659_v10, %v2653_v11  ;;  %vm3537_vm13 = vcmp.le.s32.totalorder %v2802_v21, 14 }
 0x21d   :  { %v1591_v26 = vsel %vm3525_vm9, %v1581_v17, 0  ;;  %1658 = vmatpush1.bf16.msra.mxu1 %v1597_v2  ;;  %vm3528_vm4 = vmmov %vm3514_vm3  ;;  %1675 = vmatprep.mubr.bf16.mxu1 %v3512_v60  ;;  %v1706_v27 = vpack.c.bf16 %v1702_v46, %v1702_v46  ;;  %v1933_v50 = vsel %vm3537_vm13, %v1929_v19, 0.0  ;;  %vm3538_vm10 = vcmp.le.s32.totalorder %v2792_v15, 14  ;;  %v2495_v17 = vld [vmem:[%s3414_s3 + $0x10] sm:$0xf] }
 0x21e   :  { %1617 = vmatpush1.bf16.msra.mxu0 %v1591_v26  ;;  %vm3529_vm8 = vmmov %vm3514_vm3  ;;  %v2669_v62 = vunpack.i.h.bf16 %v2667_v32  ;;  %v2668_v63 = vunpack.i.l.bf16 %v2667_v32  ;;  %v2664_v58 = vunpack.i.h.bf16 %v2662_v48  ;;  %v2663_v40 = vunpack.i.l.bf16 %v2662_v48 }
 0x21f   :  { %2491 = vmatprep.subr.msk.bf16.mxu0 %vm3528_vm4, %v1705_v29  ;;  %2493 = vmatprep.subr.msk.bf16.mxu1 %vm3529_vm8, %v1707_v43  ;;  %vm3530_vm0 = vmmov %vm3524_vm2  ;;  %v1937_v7 = vpack.c.bf16 %v1933_v50, %v1933_v50  ;;  %v2677_v8 = vpop.permute.xlu1 %2676  ;;  %v2674_v35 = vunpack.i.h.bf16 %v2672_v13  ;;  %v2673_v37 = vunpack.i.l.bf16 %v2672_v13 }
 0x220   :  { %vm3531_vm12 = vmmov %vm3530_vm0  ;;  %v2679_v1 = vunpack.i.h.bf16 %v2677_v8  ;;  %v2678_v34 = vunpack.i.l.bf16 %v2677_v8 }
 0x221   :  { %vm3532_vm15 = vmmov %vm3514_vm3 }
 0x222   :  { %2487 = vmatmul.mubr.msk.bf16.vlgmr.msra.gmra.mxu0 %vm3530_vm0, %v2485_v52  ;;  %v1714_v38 = vsel %vm3532_vm15, %v1704_v6, 0  ;;  %vm3533_vm14 = vmmov %vm3514_vm3  ;;  %vm3543_vm15 = vcmask 64512   ;;  %v2682_v6 = vpop.permute.xlu0 %2681 }
 0x223   :  { %v1720_v5 = vsel %vm3533_vm14, %v1706_v27, 0  ;;  %1740 = vmatpush1.bf16.msra.mxu0 %v1714_v38  ;;  %vm3535_vm2 = vmmov %vm3534_vm5  ;;  %1757 = vmatprep.mubr.bf16.mxu0 %v3512_v60  ;;  %vm3545_vm5 = vcmp.le.s32.totalorder %v2795_v18, 14  ;;  %v2687_v47 = vpop.permute.xlu1 %2686 }
 0x224   :  { %2489 = vmatmul.mubr.msk.bf16.vlgmr.msra.gmra.mxu1 %vm3531_vm12, %v2485_v52  ;;  %v1927_v42 = vsel %vm3535_vm2, %v2654_v3, %v2658_v53  ;;  %vm3536_vm9 = vmmov %vm3514_vm3 }
 0x225   :  { %1781 = vmatpush1.bf16.msra.mxu1 %v1720_v5  ;;  %2496 = vmatprep.subr.msk.bf16.mxu0 %vm3536_vm9, %v1812_v54  ;;  %v1931_v51 = vsel %vm3538_vm10, %v1927_v42, 0.0  ;;  %vm3539_vm4 = vmmov %vm3535_vm2  ;;  %vm3547_vm9 = vcmp.lt.s32.totalorder %v2779_v9, 113  ;;  %v2689_v54 = vunpack.i.h.bf16 %v2687_v47 }
 0x226   :  { %2498 = vmatprep.subr.msk.bf16.mxu1 %vm3514_vm3, %v1814_v55  ;;  %1798 = vmatprep.mubr.bf16.mxu1 %v3512_v60  ;;  %v1928_v57 = vsel %vm3539_vm4, %v2653_v11, %v2654_v3  ;;  %vm3540_vm8 = vmmov %vm3535_vm2  ;;  %v1935_v15 = vpack.c.bf16 %v1931_v51, %v1931_v51  ;;  %vm3546_vm2 = vcmp.le.s32.totalorder %v2804_v22, 14  ;;  %v2052_v59 = vsel %vm3547_vm9, %v2669_v62, %v2663_v40  ;;  %v3574_v51 = vld [vmem:[#allocation2_spill] sm:$0xff] }
 0x227   :  { %v1926_v41 = vsel %vm3540_vm8, %v2658_v53, %v2659_v10  ;;  %vm3541_vm0 = vmmov %vm3514_vm3  ;;  %v1930_v45 = vsel %vm3545_vm5, %v1928_v57, 0.0  ;;  %v2056_v23 = vsel %vm3011_vm7, %v2052_v59, 0.0  ;;  %vm3559_vm5 = vcmp.lt.s32.totalorder %v2779_v9, 112  ;;  %v2500_v53 = vld [vmem:[%s3414_s3 + $0x14] sm:$0xf] }
 0x228   :  { %v1821_v49 = vsel %vm3541_vm0, %v1811_v20, 0  ;;  %vm3542_vm12 = vmmov %vm3541_vm0  ;;  %v1932_v4 = vsel %vm3546_vm2, %v1926_v41, 0.0  ;;  %v1934_v14 = vpack.c.bf16 %v1930_v45, %v1930_v45  ;;  %v2060_v26 = vpack.c.bf16 %v2056_v23, %v2056_v23  ;;  %v2505_v57 = vld [vmem:[%s3414_s3 + $0x18] sm:$0xf]  ;;  %v2515_v45 = vld [vmem:[%s3414_s3 + $0x20] sm:$0xf] }
 0x229   :  { %v1827_v21 = vsel %vm3542_vm12, %v1813_v39, 0  ;;  %vm3544_vm14 = vmmov %vm3543_vm15  ;;  %v1936_v24 = vpack.c.bf16 %v1932_v4, %v1932_v4  ;;  %v2175_v44 = vsel %vm3559_vm5, %v2679_v1, %v2673_v37  ;;  %v2688_v55 = vunpack.i.l.bf16 %v2687_v47 }
 0x22a   :  { %2492 = vmatmul.mubr.msk.bf16.vlgmr.msra.gmra.mxu0 %vm3543_vm15, %v2490_v56  ;;  %vm3548_vm3 = vmmov %vm3547_vm9  ;;  %vm3557_vm15 = vcmp.ge.s32.totalorder %v2795_v18, 1  ;;  %v2179_v52 = vsel %vm2989_vm6, %v2175_v44, 0.0  ;;  %v2684_v3 = vunpack.i.h.bf16 %v2682_v6  ;;  %v2683_v11 = vunpack.i.l.bf16 %v2682_v6 }
 0x22b   :  { %1847 = vmatpush1.bf16.msra.mxu0 %v1821_v49  ;;  %v2050_v61 = vsel %vm3548_vm3, %v2664_v58, %v2668_v63  ;;  %vm3549_vm13 = vmmov %vm3541_vm0  ;;  %1864 = vmatprep.mubr.bf16.mxu0 %v3512_v60  ;;  %v2183_v19 = vpack.c.bf16 %v2179_v52, %v2179_v52 }
 0x22c   :  { %2494 = vmatmul.mubr.msk.bf16.vlgmr.msra.gmra.mxu1 %vm3544_vm14, %v2490_v56  ;;  %2501 = vmatprep.subr.msk.bf16.mxu0 %vm3549_vm13, %v1935_v15  ;;  %vm3550_vm10 = vmmov %vm3541_vm0  ;;  %v2054_v28 = vsel %vm3003_vm11, %v2050_v61, 0.0  ;;  %vm3563_vm13 = vnez %v3453_v25 }
 0x22d   :  { %1888 = vmatpush1.bf16.msra.mxu1 %v1827_v21  ;;  %1905 = vmatprep.mubr.bf16.mxu1 %v3512_v60  ;;  %vm3551_vm4 = vmmov %vm3548_vm3  ;;  %v2058_v43 = vpack.c.bf16 %v2054_v28, %v2054_v28 }
 0x22e   :  { %2503 = vmatprep.subr.msk.bf16.mxu1 %vm3550_vm10, %v1937_v7  ;;  %v2051_v0 = vsel %vm3551_vm4, %v2663_v40, %v2664_v58  ;;  %vm3552_vm8 = vmmov %vm3548_vm3  ;;  %v2510_v7 = vld [vmem:[%s3414_s3 + $0x1c] sm:$0xf] }
 0x22f   :  { %v2049_v31 = vsel %vm3552_vm8, %v2668_v63, %v2669_v62  ;;  %vm3553_vm0 = vmmov %vm3544_vm14  ;;  %v2053_v2 = vsel %vm3557_vm15, %v2051_v0, 0.0  ;;  %vm3558_vm14 = vcmp.ge.s32.totalorder %v2804_v22, 1 }
 0x230   :  { %vm3554_vm7 = vmmov %vm3553_vm0  ;;  %v2055_v29 = vsel %vm3558_vm14, %v2049_v31, 0.0  ;;  %v2057_v27 = vpack.c.bf16 %v2053_v2, %v2053_v2 }
 0x231   :  { %vm3555_vm12 = vmmov %vm3550_vm10  ;;  %v2059_v30 = vpack.c.bf16 %v2055_v29, %v2055_v29 }
 0x232   :  { %2497 = vmatmul.mubr.msk.bf16.vlgmr.msra.gmra.mxu0 %vm3553_vm0, %v2495_v17  ;;  %v1944_v12 = vsel %vm3555_vm12, %v1934_v14, 0  ;;  %vm3556_vm11 = vmmov %vm3550_vm10  ;;  %vm3570_vm12 = vcmp.lt.s32.totalorder %v2779_v9, 111 }
 0x233   :  { %v1950_v16 = vsel %vm3556_vm11, %v1936_v24, 0  ;;  %1970 = vmatpush1.bf16.msra.mxu0 %v1944_v12  ;;  %vm3560_vm2 = vmmov %vm3559_vm5  ;;  %1987 = vmatprep.mubr.bf16.mxu0 %v3512_v60  ;;  %v2298_v32 = vsel %vm3570_vm12, %v2689_v54, %v2683_v11  ;;  %vm3575_vm5 = vnez %v3574_v51 }
 0x234   :  { %2499 = vmatmul.mubr.msk.bf16.vlgmr.msra.gmra.mxu1 %vm3554_vm7, %v2495_v17  ;;  %v2173_v46 = vsel %vm3560_vm2, %v2674_v35, %v2678_v34  ;;  %vm3561_vm9 = vmmov %vm3550_vm10  ;;  %v2302_v50 = vsel %vm3079_vm1, %v2298_v32, 0.0 }
 0x235   :  { %2011 = vmatpush1.bf16.msra.mxu1 %v1950_v16  ;;  %2506 = vmatprep.subr.msk.bf16.mxu0 %vm3561_vm9, %v2058_v43  ;;  %vm3562_vm3 = vmmov %vm3561_vm9  ;;  %v2177_v10 = vsel %vm3563_vm13, %v2173_v46, 0.0  ;;  %v2306_v63 = vpack.c.bf16 %v2302_v50, %v2302_v50 }
 0x236   :  { %2508 = vmatprep.subr.msk.bf16.mxu1 %vm3562_vm3, %v2060_v26  ;;  %2028 = vmatprep.mubr.bf16.mxu1 %v3512_v60  ;;  %vm3564_vm10 = vmmov %vm3553_vm0  ;;  %v2181_v5 = vpack.c.bf16 %v2177_v10, %v2177_v10 }
 0x237   :  { %vm3565_vm4 = vmmov %vm3553_vm0 }
 0x238   :  { %vm3566_vm8 = vmmov %vm3562_vm3 }
 0x239   :  { %v2067_v38 = vsel %vm3566_vm8, %v2057_v27, 0  ;;  %vm3567_vm0 = vmmov %vm3562_vm3  ;;  %vm3583_vm8 = vcmp.le.s32.totalorder %v2804_v22, 14 }
 0x23a   :  { %2502 = vmatmul.mubr.msk.bf16.vlgmr.msra.gmra.mxu0 %vm3564_vm10, %v2500_v53  ;;  %v2073_v36 = vsel %vm3567_vm0, %v2059_v30, 0  ;;  %vm3568_vm6 = vmmov %vm3560_vm2 }
 0x23b   :  { %2093 = vmatpush1.bf16.msra.mxu0 %v2067_v38  ;;  %v2174_v25 = vsel %vm3568_vm6, %v2673_v37, %v2674_v35  ;;  %vm3569_vm7 = vmmov %vm3560_vm2  ;;  %2110 = vmatprep.mubr.bf16.mxu0 %v3512_v60 }
 0x23c   :  { %2504 = vmatmul.mubr.msk.bf16.vlgmr.msra.gmra.mxu1 %vm3565_vm4, %v2500_v53  ;;  %v2172_v42 = vsel %vm3569_vm7, %v2678_v34, %v2679_v1  ;;  %vm3571_vm11 = vmmov %vm3570_vm12  ;;  %v2180_v39 = vpack.c.bf16 %v2174_v25, %v2174_v25 }
 0x23d   :  { %2134 = vmatpush1.bf16.msra.mxu1 %v2073_v36  ;;  %v2296_v20 = vsel %vm3571_vm11, %v2684_v3, %v2688_v55  ;;  %vm3572_vm15 = vmmov %vm3567_vm0  ;;  %2151 = vmatprep.mubr.bf16.mxu1 %v3512_v60  ;;  %v2182_v48 = vpack.c.bf16 %v2172_v42, %v2172_v42 }
 0x23e   :  { %2511 = vmatprep.subr.msk.bf16.mxu0 %vm3572_vm15, %v2181_v5  ;;  %vm3573_vm14 = vmmov %vm3567_vm0  ;;  %v2300_v56 = vsel %vm3575_vm5, %v2296_v20, 0.0 }
 0x23f   :  { %2513 = vmatprep.subr.msk.bf16.mxu1 %vm3573_vm14, %v2183_v19  ;;  %vm3576_vm2 = vmmov %vm3571_vm11  ;;  %v2304_v49 = vpack.c.bf16 %v2300_v56, %v2300_v56 }
 0x240   :  { %v2297_v41 = vsel %vm3576_vm2, %v2683_v11, %v2684_v3  ;;  %vm3577_vm9 = vmmov %vm3576_vm2 }
 0x241   :  { %v2295_v62 = vsel %vm3577_vm9, %v2688_v55, %v2689_v54  ;;  %vm3578_vm3 = vmmov %vm3565_vm4  ;;  %vm3582_vm4 = vcmp.le.s32.totalorder %v2795_v18, 14 }
 0x242   :  { %2507 = vmatmul.mubr.msk.bf16.vlgmr.msra.gmra.mxu0 %vm3578_vm3, %v2505_v57  ;;  %vm3579_vm13 = vmmov %vm3578_vm3  ;;  %v2299_v58 = vsel %vm3582_vm4, %v2297_v41, 0.0  ;;  %v2301_v40 = vsel %vm3583_vm8, %v2295_v62, 0.0 }
 0x243   :  { %vm3580_vm1 = vmmov %vm3567_vm0  ;;  %2233 = vmatprep.mubr.bf16.mxu0 %v3512_v60  ;;  %v2303_v9 = vpack.c.bf16 %v2299_v58, %v2299_v58  ;;  %v2305_v15 = vpack.c.bf16 %v2301_v40, %v2301_v40 }
 0x244   :  { %2509 = vmatmul.mubr.msk.bf16.vlgmr.msra.gmra.mxu1 %vm3579_vm13, %v2505_v57  ;;  %v2190_v33 = vsel %vm3580_vm1, %v2180_v39, 0  ;;  %vm3581_vm10 = vmmov %vm3567_vm0 }
 0x245   :  { %v2196_v21 = vsel %vm3581_vm10, %v2182_v48, 0  ;;  %2216 = vmatpush1.bf16.msra.mxu0 %v2190_v33  ;;  %vm3584_vm6 = vmmov %vm3567_vm0  ;;  %2274 = vmatprep.mubr.bf16.mxu1 %v3512_v60 }
 0x246   :  { %2257 = vmatpush1.bf16.msra.mxu1 %v2196_v21  ;;  %2516 = vmatprep.subr.msk.bf16.mxu0 %vm3567_vm0, %v2304_v49  ;;  %vm3585_vm7 = vmmov %vm3578_vm3 }
 0x247   :  { %2518 = vmatprep.subr.msk.bf16.mxu1 %vm3584_vm6, %v2306_v63  ;;  %vm3586_vm12 = vmmov %vm3578_vm3 }
 0x248   :  { %vm3587_vm11 = vmmov %vm3567_vm0 }
 0x249   :  { %v2313_v18 = vsel %vm3587_vm11, %v2303_v9, 0  ;;  %vm3588_vm15 = vmmov %vm3567_vm0 }
 0x24a   :  { %2512 = vmatmul.mubr.msk.bf16.vlgmr.msra.gmra.mxu0 %vm3585_vm7, %v2510_v7  ;;  %v2319_v22 = vsel %vm3588_vm15, %v2305_v15, 0  ;;  %vm3589_vm14 = vmmov %vm3578_vm3 }
 0x24b   :  { %2339 = vmatpush1.bf16.msra.mxu0 %v2313_v18  ;;  %2356 = vmatprep.mubr.bf16.mxu0 %v3512_v60  ;;  %vm3590_vm5 = vmmov %vm3578_vm3 }
 0x24c   :  { %2514 = vmatmul.mubr.msk.bf16.vlgmr.msra.gmra.mxu1 %vm3586_vm12, %v2510_v7 }
 0x24d   :  { %2380 = vmatpush1.bf16.msra.mxu1 %v2319_v22  ;;  %2397 = vmatprep.mubr.bf16.mxu1 %v3512_v60 }
 0x252   :  { %2517 = vmatmul.mubr.msk.bf16.vlgmr.msra.gmra.mxu0 %vm3589_vm14, %v2515_v45 }
 0x254   :  { %2519 = vmatmul.mubr.msk.bf16.vlgmr.msra.gmra.mxu1 %vm3590_vm5, %v2515_v45 }
 0x2d2   :  { %v1420_v4 = vpop.f32.mrf.mxu0 }
 0x2d4   :  { %v1461_v59 = vpop.f32.mrf.mxu1  ;;  %v1422_v61 = vpop.f32.mrf.mxu0 }
 0x2d6   :  { %v1463_v8 = vpop.f32.mrf.mxu1  ;;  %v1424_v13 = vpop.f32.mrf.mxu0 }
 0x2d8   :  { %v1465_v14 = vpop.f32.mrf.mxu1  ;;  %v1425_v24 = vpop.f32.mrf.mxu0 }
 0x2da   :  { %v1466_v23 = vpop.f32.mrf.mxu1  ;;  %v1517_v28 = vpop.f32.mrf.mxu0 }
 0x2db   :  { %v1518_v63 = vadd.f32 %v1517_v28, %v1420_v4 }
 0x2dc   :  { %v1558_v17 = vpop.f32.mrf.mxu1  ;;  %v1519_v0 = vpop.f32.mrf.mxu0 }
 0x2dd   :  { %v1559_v49 = vadd.f32 %v1558_v17, %v1461_v59  ;;  %v1520_v58 = vadd.f32 %v1519_v0, %v1422_v61 }
 0x2de   :  { %v1560_v60 = vpop.f32.mrf.mxu1  ;;  %v1521_v31 = vpop.f32.mrf.mxu0 }
 0x2df   :  { %v1561_v40 = vadd.f32 %v1560_v60, %v1463_v8 }
 0x2e0   :  { %v1562_v1 = vpop.f32.mrf.mxu1  ;;  %v1522_v34 = vpop.f32.mrf.mxu0 }
 0x2e2   :  { %v1563_v35 = vpop.f32.mrf.mxu1  ;;  %v1636_v37 = vpop.f32.mrf.mxu0 }
 0x2e3   :  { %v1684_v9 = vadd.f32 %v1636_v37, %v1518_v63 }
 0x2e4   :  { %v1677_v12 = vpop.f32.mrf.mxu1  ;;  %v1638_v16 = vpop.f32.mrf.mxu0 }
 0x2e5   :  { %v1686_v15 = vadd.f32 %v1677_v12, %v1559_v49  ;;  %v1685_v22 = vadd.f32 %v1638_v16, %v1520_v58 }
 0x2e6   :  { %v1679_v43 = vpop.f32.mrf.mxu1  ;;  %v1640_v26 = vpop.f32.mrf.mxu0 }
 0x2e7   :  { %v1687_v45 = vadd.f32 %v1679_v43, %v1561_v40 }
 0x2e8   :  { %v1681_v2 = vpop.f32.mrf.mxu1  ;;  %v1641_v29 = vpop.f32.mrf.mxu0 }
 0x2ea   :  { %v1682_v44 = vpop.f32.mrf.mxu1  ;;  %v1759_v46 = vpop.f32.mrf.mxu0 }
 0x2eb   :  { %v1807_v13 = vadd.f32 %v1759_v46, %v1684_v9 }
 0x2ec   :  { %v1800_v47 = vpop.f32.mrf.mxu1  ;;  %v1761_v6 = vpop.f32.mrf.mxu0 }
 0x2ed   :  { %v1809_v14 = vadd.f32 %v1800_v47, %v1686_v15  ;;  %v1808_v31 = vadd.f32 %v1761_v6, %v1685_v22 }
 0x2ee   :  { %v1802_v27 = vpop.f32.mrf.mxu1  ;;  %v1763_v30 = vpop.f32.mrf.mxu0 }
 0x2ef   :  { %v1810_v1 = vadd.f32 %v1802_v27, %v1687_v45  ;;  %v2414_v30 = vpop.permute.xlu0 %2413 }
 0x2f0   :  { %v1804_v52 = vpop.f32.mrf.mxu1  ;;  %v1764_v10 = vpop.f32.mrf.mxu0 }
 0x2f2   :  { %v1805_v53 = vpop.f32.mrf.mxu1  ;;  %v1866_v54 = vpop.f32.mrf.mxu0 }
 0x2f3   :  { %v1914_v34 = vadd.f32 %v1866_v54, %v1807_v13 }
 0x2f4   :  { %v1907_v55 = vpop.f32.mrf.mxu1  ;;  %v1868_v3 = vpop.f32.mrf.mxu0 }
 0x2f5   :  { %v1916_v35 = vadd.f32 %v1907_v55, %v1809_v14  ;;  %v1915_v28 = vadd.f32 %v1868_v3, %v1808_v31 }
 0x2f6   :  { %v1909_v11 = vpop.f32.mrf.mxu1  ;;  %v1870_v38 = vpop.f32.mrf.mxu0 }
 0x2f7   :  { %v1917_v17 = vadd.f32 %v1909_v11, %v1810_v1 }
 0x2f8   :  { %v1911_v36 = vpop.f32.mrf.mxu1  ;;  %v1871_v5 = vpop.f32.mrf.mxu0 }
 0x2fa   :  { %v1912_v19 = vpop.f32.mrf.mxu1  ;;  %v1989_v25 = vpop.f32.mrf.mxu0 }
 0x2fb   :  { %v2037_v61 = vadd.f32 %v1989_v25, %v1914_v34 }
 0x2fc   :  { %v2030_v42 = vpop.f32.mrf.mxu1  ;;  %v1991_v32 = vpop.f32.mrf.mxu0 }
 0x2fd   :  { %v2039_v8 = vadd.f32 %v2030_v42, %v1916_v35  ;;  %v2038_v37 = vadd.f32 %v1991_v32, %v1915_v28  ;;  %v2690_v42 = vld [vmem:[%s3410_s0] sm:$0xff] }
 0x2fe   :  { %v2032_v20 = vpop.f32.mrf.mxu1  ;;  %v1993_v39 = vpop.f32.mrf.mxu0 }
 0x2ff   :  { %v2040_v12 = vadd.f32 %v2032_v20, %v1917_v17  ;;  %v2691_v20 = vld [vmem:[%s3410_s0 + $0x10] sm:$0xff] }
 0x300   :  { %v2034_v48 = vpop.f32.mrf.mxu1  ;;  %v1994_v50 = vpop.f32.mrf.mxu0 }
 0x302   :  { %v2035_v51 = vpop.f32.mrf.mxu1  ;;  %v2112_v56 = vpop.f32.mrf.mxu0 }
 0x303   :  { %v2160_v16 = vadd.f32 %v2112_v56, %v2037_v61 }
 0x304   :  { %v2153_v57 = vpop.f32.mrf.mxu1  ;;  %v2114_v41 = vpop.f32.mrf.mxu0 }
 0x305   :  { %v2162_v43 = vadd.f32 %v2153_v57, %v2039_v8  ;;  %v2161_v29 = vadd.f32 %v2114_v41, %v2038_v37  ;;  %v2692_v57 = vld [vmem:[%s3410_s0 + $0x8] sm:$0xff] }
 0x306   :  { %v2155_v62 = vpop.f32.mrf.mxu1  ;;  %v2116_v33 = vpop.f32.mrf.mxu0 }
 0x307   :  { %v2163_v44 = vadd.f32 %v2155_v62, %v2040_v12  ;;  %v2693_v62 = vld [vmem:[%s3410_s0 + $0x18] sm:$0xff] }
 0x308   :  { %v2157_v21 = vpop.f32.mrf.mxu1  ;;  %v2117_v7 = vpop.f32.mrf.mxu0 }
 0x30a   :  { %v2158_v18 = vpop.f32.mrf.mxu1  ;;  %v2235_v24 = vpop.f32.mrf.mxu0 }
 0x30b   :  { %v2283_v46 = vadd.f32 %v2235_v24, %v2160_v16 }
 0x30c   :  { %v2276_v23 = vpop.f32.mrf.mxu1  ;;  %v2237_v4 = vpop.f32.mrf.mxu0 }
 0x30d   :  { %v2285_v47 = vadd.f32 %v2276_v23, %v2162_v43  ;;  %v2284_v52 = vadd.f32 %v2237_v4, %v2161_v29 }
 0x30e   :  { %v2278_v59 = vpop.f32.mrf.mxu1  ;;  %v2239_v0 = vpop.f32.mrf.mxu0 }
 0x30f   :  { %v2286_v10 = vadd.f32 %v2278_v59, %v2163_v44 }
 0x310   :  { %v2280_v60 = vpop.f32.mrf.mxu1  ;;  %v2240_v26 = vpop.f32.mrf.mxu0 }
 0x312   :  { %v2281_v2 = vpop.f32.mrf.mxu1  ;;  %v2358_v6 = vpop.f32.mrf.mxu0 }
 0x313   :  { %v2406_v53 = vadd.f32 %v2358_v6, %v2283_v46 }
 0x314   :  { %v2399_v27 = vpop.f32.mrf.mxu1  ;;  %v2360_v55 = vpop.f32.mrf.mxu0 }
 0x315   :  { %v2408_v54 = vadd.f32 %v2399_v27, %v2285_v47  ;;  %v2416_v11 = vadd.f32 %v2414_v30, %v2406_v53  ;;  %v2407_v36 = vadd.f32 %v2360_v55, %v2284_v52 }
 0x316   :  { %v2401_v3 = vpop.f32.mrf.mxu1  ;;  %v2362_v19 = vpop.f32.mrf.mxu0 }
 0x317   :  { %v2418_v38 = vadd.f32 %v2414_v30, %v2408_v54  ;;  %v2409_v5 = vadd.f32 %v2401_v3, %v2286_v10  ;;  %v2420_v32 = vadd.f32 %v2690_v42, %v2416_v11  ;;  %v2417_v48 = vadd.f32 %v2414_v30, %v2407_v36 }
 0x318   :  { %v2403_v25 = vpop.f32.mrf.mxu1  ;;  %v2363_v51 = vpop.f32.mrf.mxu0 }
 0x319   :  { %v2422_v39 = vadd.f32 %v2691_v20, %v2418_v38  ;;  %v2419_v50 = vadd.f32 %v2414_v30, %v2409_v5  ;;  %2424 = vst [vmem:[%s3415_s5] sm:$0xff] %v2420_v32  ;;  %v2421_v41 = vadd.f32 %v2692_v57, %v2417_v48 }
 0x31a   :  { %v2404_v56 = vpop.f32.mrf.mxu1 }
 0x31b   :  { %2426 = vst [vmem:[%s3415_s5 + $0x10] sm:$0xff] %v2422_v39  ;;  %v2423_v63 = vadd.f32 %v2693_v62, %v2419_v50  ;;  %2425 = vst [vmem:[%s3415_s5 + $0x8] sm:$0xff] %v2421_v41 }
 0x31d   :  { %2427 = vst [vmem:[%s3415_s5 + $0x18] sm:$0xff] %v2423_v63 }

</bundles_post_ra>
